<compile_context>
chip_gen: v7x
topology: tpu7x:2x2x1
jax: 0.10.0
libtpu: 0.0.40
codegen_flags: <defaults>
</compile_context>

<pallas_src>
import jax
import jax.numpy as jnp
from jax import lax
from jax.experimental import pallas as pl
from jax.experimental.pallas import tpu as pltpu

# ----------------------------- static configuration -----------------------------
BS           = 2           # batch size
NUM_CAMS     = 2
IMG_H        = 8
IMG_W        = 8
FEAT         = 3           # rgb features per pixel
N_POINTS     = NUM_CAMS * IMG_H * IMG_W          # 128 points per batch element
VOXEL_SIZE   = 8
NUM_VOX      = VOXEL_SIZE ** 3                   # 512 voxels
C_VOX        = 3 + FEAT + 1                      # mean xyz + mean feat + occupancy = 7
C_PAD        = 8                                 # padded rows: 7 vox channels + q_trans row
PROP_DIM     = 4
LANG_DIM     = 16
ROT_RES      = 45.0
NUM_ROT      = int(360 // ROT_RES)               # 8
ROT_GRIP_DIM = 3 * NUM_ROT + 2                   # 26
COLL_DIM     = 2
HEAD_DIM     = ROT_GRIP_DIM + COLL_DIM           # 28 (fused rot/grip + collision head)
HEAD_PAD     = 128                               # lane-dense head output width
GFEAT        = C_VOX + PROP_DIM + LANG_DIM       # 27
PL_PAD       = 32                                # packed proprio+lang+bias-one width
V_CHUNK      = 256                               # scatter-matmul chunk (256-wide MXU)

# SMEM scalar-array layout: [ wt (C_VOX) | bt (1) | bounds (bs*6, row-major) ]
WT_OFF     = 0
BT_OFF     = C_VOX
BOUNDS_OFF = C_VOX + 1


# ------------------------------ fused forward kernel ------------------------------
def qfunction_kernel(scal_ref,                    # SMEM f32[8 + bs*6]
                     pts_ref,                     # VMEM (bs, 8, N): xyz|rgb|ones|zeros
                     pl_ref,                      # VMEM (bs, 1, 32): prop|lang|1|zeros
                     w_ref,                       # VMEM (40, 128): Wv (8,128) | Wpl (32,128)
                     vox_ref,                     # out  (bs, 8, NUM_VOX): vox rows 0..6, qt row 7
                     head_ref):                   # out  (bs, 1, 128)
    bs = pts_ref.shape[0]
    wv  = w_ref[0:8, :]                           # pooled-voxel head weights (row 7 zero)
    wpl = w_ref[8:8 + PL_PAD, :]                  # prop/lang head weights (+ bias row 20)
    bt  = scal_ref[BT_OFF]

    # hoisted: one iota shared by every chunk and batch element (JAX does not CSE these)
    vids = lax.broadcasted_iota(jnp.int32, (V_CHUNK, N_POINTS), 0)
    ones_row = jnp.ones((1, NUM_VOX), jnp.float32)

    for b in range(bs):                           # batch unrolled: single grid step
        base = BOUNDS_OFF + b * 6
        bx, by, bz = scal_ref[base + 0], scal_ref[base + 1], scal_ref[base + 2]
        ex, ey, ez = scal_ref[base + 3], scal_ref[base + 4], scal_ref[base + 5]

        pts = pts_ref[b]                          # (8, N) = xyz(3) | rgb(3) | ones | zeros

        def vox_idx(row, lo, hi):
            # idx = floor((p - lo) / res), res = (hi - lo) / VOXEL_SIZE; eps guards hi==lo
            inv_res = float(VOXEL_SIZE) / jnp.maximum(hi - lo, 1e-6)
            idx = jnp.floor((pts[row:row + 1, :] - lo) * inv_res)
            return jnp.clip(idx, 0.0, float(VOXEL_SIZE - 1)).astype(jnp.int32)

        ix = vox_idx(0, bx, ex)                   # (1, N)
        iy = vox_idx(1, by, ey)
        iz = vox_idx(2, bz, ez)
        flat = ix * (VOXEL_SIZE * VOXEL_SIZE) + iy * VOXEL_SIZE + iz      # (1, N)

        # scatter-sum via chunked one-hot matmuls -> lane-dense (8, V)
        chunks = []
        for c in range(NUM_VOX // V_CHUNK):
            onehot_t = (vids == (flat - c * V_CHUNK)).astype(jnp.float32)  # (V_CHUNK, N)
            chunks.append(lax.dot_general(
                pts, onehot_t, (((1,), (1,)), ((), ())),
                preferred_element_type=jnp.float32))                       # (8, V_CHUNK)
        sums8 = jnp.concatenate(chunks, axis=-1)                            # (8, V)

        counts = sums8[6:7, :]                                              # (1, V)
        occ = (counts > 0.0).astype(jnp.float32)                            # exact 0/1
        inv_cnt = pl.reciprocal(jnp.maximum(counts, 1.0), approx=True)      # EUP slot
        mean6 = sums8[0:6, :] * inv_cnt                                     # (6, V)

        # translation head: per-voxel 1x1x1 conv, scalar weights from SMEM
        qt = jnp.zeros((1, NUM_VOX), jnp.float32) + bt
        for c in range(6):
            qt = qt + scal_ref[WT_OFF + c] * mean6[c:c + 1, :]
        qt = qt + scal_ref[WT_OFF + 6] * occ                                # (1, V)

        # merged (8, V) tile: voxel grid rows 0..6, q_trans row 7 -> ONE unmasked store
        out8 = jnp.concatenate([mean6, occ, qt], axis=0)                    # (8, V)
        vox_ref[b] = out8

        # pooled rot/grip + collision head (bias folded into wpl via constant-1 lane).
        # g8[7] = mean(qt) but wv row 7 is zero, so the pad row contributes nothing.
        g8 = lax.dot_general(ones_row, out8, (((1,), (1,)), ((), ())),
                             preferred_element_type=jnp.float32) * (1.0 / NUM_VOX)  # (1, 8)
        head = (jnp.dot(g8, wv, preferred_element_type=jnp.float32) +
                jnp.dot(pl_ref[b], wpl, preferred_element_type=jnp.float32))        # (1, 128)
        head_ref[b] = head


def qfunction_pallas(scal, pts8, pl32, wpacked):
    bs = pts8.shape[0]
    return pl.pallas_call(
        qfunction_kernel,
        out_shape=(
            jax.ShapeDtypeStruct((bs, C_PAD, NUM_VOX), jnp.float32),   # vox grid + q_trans
            jax.ShapeDtypeStruct((bs, 1, HEAD_PAD), jnp.float32),      # rot/grip + collision
        ),
        grid_spec=pltpu.PrefetchScalarGridSpec(
            num_scalar_prefetch=0,
            grid=(1,),                                                 # single step, batch unrolled
            in_specs=[
                pl.BlockSpec(memory_space=pltpu.MemorySpace.SMEM),               # scalars
                pl.BlockSpec((bs, C_PAD, N_POINTS), lambda i: (0, 0, 0)),        # points (8 rows)
                pl.BlockSpec((bs, 1, PL_PAD), lambda i: (0, 0, 0)),              # prop|lang|1
                pl.BlockSpec((8 + PL_PAD, HEAD_PAD), lambda i: (0, 0)),          # packed head W
            ],
            out_specs=[
                pl.BlockSpec((bs, C_PAD, NUM_VOX), lambda i: (0, 0, 0)),
                pl.BlockSpec((bs, 1, HEAD_PAD), lambda i: (0, 0, 0)),
            ],
        ),
        compiler_params=pltpu.CompilerParams(dimension_semantics=("arbitrary",)),
    )(scal, pts8, pl32, wpacked)


# ------------------------------- QFunction.forward -------------------------------
@jax.jit
def q_function_forward(obs, proprio, pcd, lang_goal_embs, bounds, params):
    bs = obs[0][0].shape[0]

    # channels-first flatten (no transposes): (B, 3, H, W) -> (B, 3, H*W), concat cams.
    pcd_cf = jnp.concatenate([p.reshape(bs, 3, -1) for p in pcd], axis=2)       # (B, 3, N)
    image_features = [o[0] for o in obs]
    feat_size = image_features[0].shape[1]
    feats_cf = jnp.concatenate(
        [f.reshape(bs, feat_size, -1) for f in image_features], axis=2)         # (B, FEAT, N)
    n = pcd_cf.shape[2]

    # 8-row point/feature block: xyz(3) | rgb(3) | ones(1) | zero pad(1)
    pts8 = jnp.concatenate(
        [pcd_cf, feats_cf,
         jnp.ones((bs, 1, n), jnp.float32), jnp.zeros((bs, 1, n), jnp.float32)],
        axis=1)                                                                  # (B, 8, N)

    # packed proprio | pooled lang | bias-one | zeros  -> (B, 1, 32)
    lang_mean = jnp.mean(lang_goal_embs, axis=1, keepdims=True)                  # (B, 1, L)
    prop3 = proprio.reshape(bs, 1, PROP_DIM)
    pl32 = jnp.concatenate(
        [prop3, lang_mean, jnp.ones((bs, 1, 1), jnp.float32),
         jnp.zeros((bs, 1, PL_PAD - PROP_DIM - LANG_DIM - 1), jnp.float32)],
        axis=2)                                                                  # (B, 1, 32)

    # bounds: repeat to per-batch rows (matches torch `bounds.repeat(bs, 1)`).
    bounds_b = bounds if bounds.shape[0] == bs else jnp.broadcast_to(bounds, (bs, 6))

    wt, bt, wh, bh = params
    # 1-D SMEM scalar array: [wt(7) | bt(1) | bounds(bs*6)]
    scal = jnp.concatenate(
        [wt.reshape(-1), bt.reshape(-1), bounds_b.reshape(-1)]).astype(jnp.float32)

    # packed head weights (40, 128): rows 0:8 = pooled-voxel weights (row 7 zero),
    # rows 8:40 = prop(4) + lang(16) weights with the bias folded in at row 20.
    wv = jnp.zeros((8, HEAD_PAD), jnp.float32).at[0:C_VOX, 0:HEAD_DIM].set(wh[0:C_VOX])
    wpl = jnp.zeros((PL_PAD, HEAD_PAD), jnp.float32)
    wpl = wpl.at[0:PROP_DIM, 0:HEAD_DIM].set(wh[C_VOX:C_VOX + PROP_DIM])
    wpl = wpl.at[PROP_DIM:PROP_DIM + LANG_DIM, 0:HEAD_DIM].set(wh[C_VOX + PROP_DIM:GFEAT])
    wpl = wpl.at[PROP_DIM + LANG_DIM, 0:HEAD_DIM].set(bh[0])
    wpacked = jnp.concatenate([wv, wpl], axis=0)                                 # (40, 128)

    vox8, head = qfunction_pallas(scal, pts8, pl32, wpacked)

    # lane-dense kernel outputs -> NCDHW / flat heads with free slices + reshapes.
    voxel_grid = vox8[:, 0:C_VOX, :].reshape(bs, C_VOX, VOXEL_SIZE, VOXEL_SIZE, VOXEL_SIZE)
    q_trans = vox8[:, C_VOX:C_VOX + 1, :].reshape(bs, 1, VOXEL_SIZE, VOXEL_SIZE, VOXEL_SIZE)
    rot_and_grip_q = head[:, 0, :ROT_GRIP_DIM]                                   # (B, 26)
    collision_q = head[:, 0, ROT_GRIP_DIM:HEAD_DIM]                              # (B, 2)
    return q_trans, rot_and_grip_q, collision_q, voxel_grid


# ---------------------------------- parameters ------------------------------------
def init_params(key):
    k1, k2 = jax.random.split(key, 2)
    wt = jax.random.normal(k1, (1, C_VOX), jnp.float32) * 0.1          # 1x1x1 conv (q_trans)
    bt = jnp.zeros((1, 1), jnp.float32)
    wh = jax.random.normal(k2, (GFEAT, HEAD_DIM), jnp.float32) * 0.1   # fused rot/grip+coll
    bh = jnp.zeros((1, HEAD_DIM), jnp.float32)
    return (wt, bt, wh, bh)


# ------------------------------------- main ----------------------------------------
if __name__ == "__main__":
    key = jax.random.PRNGKey(0)
    kp, kr0, kr1, kc0, kc1, kprop, klang = jax.random.split(key, 7)
    params = init_params(kp)

    # obs: list of per-camera tuples; obs[i][0] is the NCHW image feature map
    rgb0 = jax.random.uniform(kr0, (BS, FEAT, IMG_H, IMG_W), jnp.float32, -1.0, 1.0)
    rgb1 = jax.random.uniform(kr1, (BS, FEAT, IMG_H, IMG_W), jnp.float32, -1.0, 1.0)
    obs = [(rgb0,), (rgb1,)]

    # pcd: list of per-camera NCHW (C=3 xyz) point-cloud maps
    pcd0 = jax.random.uniform(kc0, (BS, 3, IMG_H, IMG_W), jnp.float32, -1.0, 1.0)
    pcd1 = jax.random.uniform(kc1, (BS, 3, IMG_H, IMG_W), jnp.float32, -1.0, 1.0)
    pcd = [pcd0, pcd1]

    proprio = jax.random.uniform(kprop, (BS, PROP_DIM), jnp.float32, -1.0, 1.0)
    lang_goal_embs = jax.random.normal(klang, (BS, 8, LANG_DIM), jnp.float32)
    bounds = jnp.array([[-1.0, -1.0, -1.0, 1.0, 1.0, 1.0]], jnp.float32)         # (1, 6)

    q_trans, rot_and_grip_q, collision_q, voxel_grid = jax.block_until_ready(
        q_function_forward(obs, proprio, pcd, lang_goal_embs, bounds, params))

    assert q_trans.shape == (BS, 1, VOXEL_SIZE, VOXEL_SIZE, VOXEL_SIZE)
    assert rot_and_grip_q.shape == (BS, ROT_GRIP_DIM)
    assert collision_q.shape == (BS, COLL_DIM)
    assert voxel_grid.shape == (BS, C_VOX, VOXEL_SIZE, VOXEL_SIZE, VOXEL_SIZE)

    # exact structural sanity checks (precision-independent)
    occ = voxel_grid[:, C_VOX - 1]
    assert bool(jnp.all((occ == 0.0) | (occ == 1.0)))
    assert bool(jnp.all(jnp.sum(occ, axis=(1, 2, 3)) >= 1.0))
    assert bool(jnp.all(jnp.isfinite(q_trans)))
    assert bool(jnp.all(jnp.isfinite(rot_and_grip_q)))
    assert bool(jnp.all(jnp.isfinite(collision_q)))

    print("KERNEL_OK")
</pallas_src>

<mosaic_0001>
module attributes {stable_mosaic.version = 11 : i64} {
  func.func @qfunction_kernel(%arg0: i32, %arg1: memref<20xf32, #tpu.memory_space<smem>>, %arg2: memref<2x8x128xf32, #tpu.memory_space<vmem>>, %arg3: memref<2x1x32xf32, #tpu.memory_space<vmem>>, %arg4: memref<40x128xf32, #tpu.memory_space<vmem>>, %arg5: memref<2x8x512xf32, #tpu.memory_space<vmem>>, %arg6: memref<2x1x128xf32, #tpu.memory_space<vmem>>) attributes {dimension_semantics = [#tpu.dimension_semantics<arbitrary>], iteration_bounds = array<i64: 1>, scalar_prefetch = 0 : i64, scratch_operands = 0 : i64, tpu.core_type = #tpu.core_type<tc>, window_params = [{transform_indices = @transform_0, window_bounds = array<i64: 20>}, {pipeline_mode = #tpu.pipeline_mode<synchronous>, transform_indices = @transform_1, window_bounds = array<i64: 2, 8, 128>}, {pipeline_mode = #tpu.pipeline_mode<synchronous>, transform_indices = @transform_2, window_bounds = array<i64: 2, 1, 32>}, {pipeline_mode = #tpu.pipeline_mode<synchronous>, transform_indices = @transform_3, window_bounds = array<i64: 40, 128>}, {pipeline_mode = #tpu.pipeline_mode<synchronous>, transform_indices = @transform_4, window_bounds = array<i64: 2, 8, 512>}, {pipeline_mode = #tpu.pipeline_mode<synchronous>, transform_indices = @transform_5, window_bounds = array<i64: 2, 1, 128>}]} {
    %c0 = arith.constant 0 : index
    %c0_0 = arith.constant 0 : index
    %0 = vector.load %arg4[%c0, %c0_0] : memref<40x128xf32, #tpu.memory_space<vmem>>, vector<8x128xf32>
    %c8 = arith.constant 8 : index
    %c0_1 = arith.constant 0 : index
    %1 = vector.load %arg4[%c8, %c0_1] : memref<40x128xf32, #tpu.memory_space<vmem>>, vector<32x128xf32>
    %c7 = arith.constant 7 : index
    %2 = memref.load %arg1[%c7] : memref<20xf32, #tpu.memory_space<smem>>
    %3 = tpu.iota {dimensions = array<i32: 0>} : vector<256x128xi32>
    %cst = arith.constant 1.000000e+00 : f32
    %4 = vector.broadcast %cst : f32 to vector<1x512xf32>
    %c8_2 = arith.constant 8 : index
    %5 = memref.load %arg1[%c8_2] : memref<20xf32, #tpu.memory_space<smem>>
    %c9 = arith.constant 9 : index
    %6 = memref.load %arg1[%c9] : memref<20xf32, #tpu.memory_space<smem>>
    %c10 = arith.constant 10 : index
    %7 = memref.load %arg1[%c10] : memref<20xf32, #tpu.memory_space<smem>>
    %c11 = arith.constant 11 : index
    %8 = memref.load %arg1[%c11] : memref<20xf32, #tpu.memory_space<smem>>
    %c12 = arith.constant 12 : index
    %9 = memref.load %arg1[%c12] : memref<20xf32, #tpu.memory_space<smem>>
    %c13 = arith.constant 13 : index
    %10 = memref.load %arg1[%c13] : memref<20xf32, #tpu.memory_space<smem>>
    %c0_3 = arith.constant 0 : index
    %c0_4 = arith.constant 0 : index
    %c0_5 = arith.constant 0 : index
    %11 = vector.load %arg2[%c0_3, %c0_4, %c0_5] : memref<2x8x128xf32, #tpu.memory_space<vmem>>, vector<1x8x128xf32>
    %12 = vector.shape_cast %11 : vector<1x8x128xf32> to vector<8x128xf32>
    %13 = arith.subf %8, %5 : f32
    %cst_6 = arith.constant 9.99999997E-7 : f32
    %14 = arith.maximumf %13, %cst_6 : f32
    %cst_7 = arith.constant 8.000000e+00 : f32
    %15 = arith.divf %cst_7, %14 : f32
    %16 = vector.extract_strided_slice %12 {offsets = [0, 0], sizes = [1, 128], strides = [1, 1]} : vector<8x128xf32> to vector<1x128xf32>
    %17 = vector.broadcast %5 : f32 to vector<1x128xf32>
    %18 = arith.subf %16, %17 : vector<1x128xf32>
    %19 = vector.broadcast %15 : f32 to vector<1x128xf32>
    %20 = arith.mulf %18, %19 : vector<1x128xf32>
    %21 = math.floor %20 : vector<1x128xf32>
    %cst_8 = arith.constant 0.000000e+00 : f32
    %cst_9 = arith.constant 7.000000e+00 : f32
    %22 = vector.broadcast %cst_8 : f32 to vector<1x128xf32>
    %23 = arith.maximumf %22, %21 : vector<1x128xf32>
    %24 = vector.broadcast %cst_9 : f32 to vector<1x128xf32>
    %25 = arith.minimumf %24, %23 : vector<1x128xf32>
    %26 = arith.fptosi %25 : vector<1x128xf32> to vector<1x128xi32>
    %27 = arith.subf %9, %6 : f32
    %cst_10 = arith.constant 9.99999997E-7 : f32
    %28 = arith.maximumf %27, %cst_10 : f32
    %cst_11 = arith.constant 8.000000e+00 : f32
    %29 = arith.divf %cst_11, %28 : f32
    %30 = vector.extract_strided_slice %12 {offsets = [1, 0], sizes = [1, 128], strides = [1, 1]} : vector<8x128xf32> to vector<1x128xf32>
    %31 = vector.broadcast %6 : f32 to vector<1x128xf32>
    %32 = arith.subf %30, %31 : vector<1x128xf32>
    %33 = vector.broadcast %29 : f32 to vector<1x128xf32>
    %34 = arith.mulf %32, %33 : vector<1x128xf32>
    %35 = math.floor %34 : vector<1x128xf32>
    %cst_12 = arith.constant 0.000000e+00 : f32
    %cst_13 = arith.constant 7.000000e+00 : f32
    %36 = vector.broadcast %cst_12 : f32 to vector<1x128xf32>
    %37 = arith.maximumf %36, %35 : vector<1x128xf32>
    %38 = vector.broadcast %cst_13 : f32 to vector<1x128xf32>
    %39 = arith.minimumf %38, %37 : vector<1x128xf32>
    %40 = arith.fptosi %39 : vector<1x128xf32> to vector<1x128xi32>
    %41 = arith.subf %10, %7 : f32
    %cst_14 = arith.constant 9.99999997E-7 : f32
    %42 = arith.maximumf %41, %cst_14 : f32
    %cst_15 = arith.constant 8.000000e+00 : f32
    %43 = arith.divf %cst_15, %42 : f32
    %44 = vector.extract_strided_slice %12 {offsets = [2, 0], sizes = [1, 128], strides = [1, 1]} : vector<8x128xf32> to vector<1x128xf32>
    %45 = vector.broadcast %7 : f32 to vector<1x128xf32>
    %46 = arith.subf %44, %45 : vector<1x128xf32>
    %47 = vector.broadcast %43 : f32 to vector<1x128xf32>
    %48 = arith.mulf %46, %47 : vector<1x128xf32>
    %49 = math.floor %48 : vector<1x128xf32>
    %cst_16 = arith.constant 0.000000e+00 : f32
    %cst_17 = arith.constant 7.000000e+00 : f32
    %50 = vector.broadcast %cst_16 : f32 to vector<1x128xf32>
    %51 = arith.maximumf %50, %49 : vector<1x128xf32>
    %52 = vector.broadcast %cst_17 : f32 to vector<1x128xf32>
    %53 = arith.minimumf %52, %51 : vector<1x128xf32>
    %54 = arith.fptosi %53 : vector<1x128xf32> to vector<1x128xi32>
    %c64_i32 = arith.constant 64 : i32
    %55 = vector.broadcast %c64_i32 : i32 to vector<1x128xi32>
    %56 = arith.muli %26, %55 : vector<1x128xi32>
    %c8_i32 = arith.constant 8 : i32
    %57 = vector.broadcast %c8_i32 : i32 to vector<1x128xi32>
    %58 = arith.muli %40, %57 : vector<1x128xi32>
    %59 = arith.addi %56, %58 : vector<1x128xi32>
    %60 = arith.addi %59, %54 : vector<1x128xi32>
    %c0_i32 = arith.constant 0 : i32
    %61 = vector.broadcast %c0_i32 : i32 to vector<1x128xi32>
    %62 = arith.subi %60, %61 : vector<1x128xi32>
    %63 = vector.broadcast %62 : vector<1x128xi32> to vector<256x128xi32>
    %64 = arith.cmpi eq, %3, %63 : vector<256x128xi32>
    %65 = arith.extui %64 : vector<256x128xi1> to vector<256x128xi32>
    %66 = arith.sitofp %65 : vector<256x128xi32> to vector<256x128xf32>
    %cst_18 = arith.constant dense<0.000000e+00> : vector<8x256xf32>
    %67 = tpu.matmul %12, %66, %cst_18 {dimension_numbers = #tpu.dot_dimension_numbers<[1], [1], [0], [0], [0, 0, 1, 0], [], []>} : vector<8x128xf32>, vector<256x128xf32>, vector<8x256xf32> -> vector<8x256xf32>
    %c256_i32 = arith.constant 256 : i32
    %68 = vector.broadcast %c256_i32 : i32 to vector<1x128xi32>
    %69 = arith.subi %60, %68 : vector<1x128xi32>
    %70 = vector.broadcast %69 : vector<1x128xi32> to vector<256x128xi32>
    %71 = arith.cmpi eq, %3, %70 : vector<256x128xi32>
    %72 = arith.extui %71 : vector<256x128xi1> to vector<256x128xi32>
    %73 = arith.sitofp %72 : vector<256x128xi32> to vector<256x128xf32>
    %cst_19 = arith.constant dense<0.000000e+00> : vector<8x256xf32>
    %74 = tpu.matmul %12, %73, %cst_19 {dimension_numbers = #tpu.dot_dimension_numbers<[1], [1], [0], [0], [0, 0, 1, 0], [], []>} : vector<8x128xf32>, vector<256x128xf32>, vector<8x256xf32> -> vector<8x256xf32>
    %75 = tpu.concatenate %67, %74 in 1 : vector<8x256xf32>, vector<8x256xf32> -> vector<8x512xf32>
    %76 = vector.extract_strided_slice %75 {offsets = [6, 0], sizes = [1, 512], strides = [1, 1]} : vector<8x512xf32> to vector<1x512xf32>
    %cst_20 = arith.constant 0.000000e+00 : f32
    %77 = vector.broadcast %cst_20 : f32 to vector<1x512xf32>
    %78 = arith.cmpf ogt, %76, %77 : vector<1x512xf32>
    %79 = arith.extui %78 : vector<1x512xi1> to vector<1x512xi32>
    %80 = arith.sitofp %79 : vector<1x512xi32> to vector<1x512xf32>
    %cst_21 = arith.constant 1.000000e+00 : f32
    %81 = vector.broadcast %cst_21 : f32 to vector<1x512xf32>
    %82 = arith.maximumf %76, %81 : vector<1x512xf32>
    %83 = tpu.reciprocal %82 {approx = true} : vector<1x512xf32> -> vector<1x512xf32>
    %84 = vector.extract_strided_slice %75 {offsets = [0, 0], sizes = [6, 512], strides = [1, 1]} : vector<8x512xf32> to vector<6x512xf32>
    %85 = vector.broadcast %83 : vector<1x512xf32> to vector<6x512xf32>
    %86 = arith.mulf %84, %85 : vector<6x512xf32>
    %cst_22 = arith.constant 0.000000e+00 : f32
    %87 = vector.broadcast %cst_22 : f32 to vector<1x512xf32>
    %88 = vector.broadcast %2 : f32 to vector<1x512xf32>
    %89 = arith.addf %87, %88 : vector<1x512xf32>
    %c0_23 = arith.constant 0 : index
    %90 = memref.load %arg1[%c0_23] : memref<20xf32, #tpu.memory_space<smem>>
    %91 = vector.extract_strided_slice %86 {offsets = [0, 0], sizes = [1, 512], strides = [1, 1]} : vector<6x512xf32> to vector<1x512xf32>
    %92 = vector.broadcast %90 : f32 to vector<1x512xf32>
    %93 = arith.mulf %92, %91 : vector<1x512xf32>
    %94 = arith.addf %89, %93 : vector<1x512xf32>
    %c1 = arith.constant 1 : index
    %95 = memref.load %arg1[%c1] : memref<20xf32, #tpu.memory_space<smem>>
    %96 = vector.extract_strided_slice %86 {offsets = [1, 0], sizes = [1, 512], strides = [1, 1]} : vector<6x512xf32> to vector<1x512xf32>
    %97 = vector.broadcast %95 : f32 to vector<1x512xf32>
    %98 = arith.mulf %97, %96 : vector<1x512xf32>
    %99 = arith.addf %94, %98 : vector<1x512xf32>
    %c2 = arith.constant 2 : index
    %100 = memref.load %arg1[%c2] : memref<20xf32, #tpu.memory_space<smem>>
    %101 = vector.extract_strided_slice %86 {offsets = [2, 0], sizes = [1, 512], strides = [1, 1]} : vector<6x512xf32> to vector<1x512xf32>
    %102 = vector.broadcast %100 : f32 to vector<1x512xf32>
    %103 = arith.mulf %102, %101 : vector<1x512xf32>
    %104 = arith.addf %99, %103 : vector<1x512xf32>
    %c3 = arith.constant 3 : index
    %105 = memref.load %arg1[%c3] : memref<20xf32, #tpu.memory_space<smem>>
    %106 = vector.extract_strided_slice %86 {offsets = [3, 0], sizes = [1, 512], strides = [1, 1]} : vector<6x512xf32> to vector<1x512xf32>
    %107 = vector.broadcast %105 : f32 to vector<1x512xf32>
    %108 = arith.mulf %107, %106 : vector<1x512xf32>
    %109 = arith.addf %104, %108 : vector<1x512xf32>
    %c4 = arith.constant 4 : index
    %110 = memref.load %arg1[%c4] : memref<20xf32, #tpu.memory_space<smem>>
    %111 = vector.extract_strided_slice %86 {offsets = [4, 0], sizes = [1, 512], strides = [1, 1]} : vector<6x512xf32> to vector<1x512xf32>
    %112 = vector.broadcast %110 : f32 to vector<1x512xf32>
    %113 = arith.mulf %112, %111 : vector<1x512xf32>
    %114 = arith.addf %109, %113 : vector<1x512xf32>
    %c5 = arith.constant 5 : index
    %115 = memref.load %arg1[%c5] : memref<20xf32, #tpu.memory_space<smem>>
    %116 = vector.extract_strided_slice %86 {offsets = [5, 0], sizes = [1, 512], strides = [1, 1]} : vector<6x512xf32> to vector<1x512xf32>
    %117 = vector.broadcast %115 : f32 to vector<1x512xf32>
    %118 = arith.mulf %117, %116 : vector<1x512xf32>
    %119 = arith.addf %114, %118 : vector<1x512xf32>
    %c6 = arith.constant 6 : index
    %120 = memref.load %arg1[%c6] : memref<20xf32, #tpu.memory_space<smem>>
    %121 = vector.broadcast %120 : f32 to vector<1x512xf32>
    %122 = arith.mulf %121, %80 : vector<1x512xf32>
    %123 = arith.addf %119, %122 : vector<1x512xf32>
    %124 = tpu.concatenate %86, %80, %123 in 0 : vector<6x512xf32>, vector<1x512xf32>, vector<1x512xf32> -> vector<8x512xf32>
    %c0_24 = arith.constant 0 : index
    %c0_25 = arith.constant 0 : index
    %c0_26 = arith.constant 0 : index
    %125 = vector.load %arg5[%c0_24, %c0_25, %c0_26] : memref<2x8x512xf32, #tpu.memory_space<vmem>>, vector<1x8x512xf32>
    %126 = vector.shape_cast %125 : vector<1x8x512xf32> to vector<8x512xf32>
    %127 = vector.shape_cast %124 : vector<8x512xf32> to vector<1x8x512xf32>
    tpu.vector_store %arg5[%c0_24, %c0_25, %c0_26], %127 {strides = array<i32>} : memref<2x8x512xf32, #tpu.memory_space<vmem>>, vector<1x8x512xf32>,
    %cst_27 = arith.constant dense<0.000000e+00> : vector<1x8xf32>
    %128 = tpu.matmul %4, %124, %cst_27 {dimension_numbers = #tpu.dot_dimension_numbers<[1], [1], [0], [0], [0, 0, 1, 0], [], []>} : vector<1x512xf32>, vector<8x512xf32>, vector<1x8xf32> -> vector<1x8xf32>
    %cst_28 = arith.constant 0.001953125 : f32
    %129 = vector.broadcast %cst_28 : f32 to vector<1x8xf32>
    %130 = arith.mulf %128, %129 : vector<1x8xf32>
    %cst_29 = arith.constant dense<0.000000e+00> : vector<1x128xf32>
    %131 = tpu.matmul %130, %0, %cst_29 {dimension_numbers = #tpu.dot_dimension_numbers<[1], [0], [0], [1], [0, 0, 1, 1], [], []>} : vector<1x8xf32>, vector<8x128xf32>, vector<1x128xf32> -> vector<1x128xf32>
    %c0_30 = arith.constant 0 : index
    %c0_31 = arith.constant 0 : index
    %c0_32 = arith.constant 0 : index
    %132 = vector.load %arg3[%c0_30, %c0_31, %c0_32] : memref<2x1x32xf32, #tpu.memory_space<vmem>>, vector<1x1x32xf32>
    %133 = vector.shape_cast %132 : vector<1x1x32xf32> to vector<1x32xf32>
    %cst_33 = arith.constant dense<0.000000e+00> : vector<1x128xf32>
    %134 = tpu.matmul %133, %1, %cst_33 {dimension_numbers = #tpu.dot_dimension_numbers<[1], [0], [0], [1], [0, 0, 1, 1], [], []>} : vector<1x32xf32>, vector<32x128xf32>, vector<1x128xf32> -> vector<1x128xf32>
    %135 = arith.addf %131, %134 : vector<1x128xf32>
    %c0_34 = arith.constant 0 : index
    %c0_35 = arith.constant 0 : index
    %c0_36 = arith.constant 0 : index
    %136 = vector.load %arg6[%c0_34, %c0_35, %c0_36] : memref<2x1x128xf32, #tpu.memory_space<vmem>>, vector<1x1x128xf32>
    %137 = vector.shape_cast %136 : vector<1x1x128xf32> to vector<1x128xf32>
    %138 = vector.shape_cast %135 : vector<1x128xf32> to vector<1x1x128xf32>
    tpu.vector_store %arg6[%c0_34, %c0_35, %c0_36], %138 {strides = array<i32>} : memref<2x1x128xf32, #tpu.memory_space<vmem>>, vector<1x1x128xf32>,
    %c14 = arith.constant 14 : index
    %139 = memref.load %arg1[%c14] : memref<20xf32, #tpu.memory_space<smem>>
    %c15 = arith.constant 15 : index
    %140 = memref.load %arg1[%c15] : memref<20xf32, #tpu.memory_space<smem>>
    %c16 = arith.constant 16 : index
    %141 = memref.load %arg1[%c16] : memref<20xf32, #tpu.memory_space<smem>>
    %c17 = arith.constant 17 : index
    %142 = memref.load %arg1[%c17] : memref<20xf32, #tpu.memory_space<smem>>
    %c18 = arith.constant 18 : index
    %143 = memref.load %arg1[%c18] : memref<20xf32, #tpu.memory_space<smem>>
    %c19 = arith.constant 19 : index
    %144 = memref.load %arg1[%c19] : memref<20xf32, #tpu.memory_space<smem>>
    %c1_37 = arith.constant 1 : index
    %c0_38 = arith.constant 0 : index
    %c0_39 = arith.constant 0 : index
    %145 = vector.load %arg2[%c1_37, %c0_38, %c0_39] : memref<2x8x128xf32, #tpu.memory_space<vmem>>, vector<1x8x128xf32>
    %146 = vector.shape_cast %145 : vector<1x8x128xf32> to vector<8x128xf32>
    %147 = arith.subf %142, %139 : f32
    %cst_40 = arith.constant 9.99999997E-7 : f32
    %148 = arith.maximumf %147, %cst_40 : f32
    %cst_41 = arith.constant 8.000000e+00 : f32
    %149 = arith.divf %cst_41, %148 : f32
    %150 = vector.extract_strided_slice %146 {offsets = [0, 0], sizes = [1, 128], strides = [1, 1]} : vector<8x128xf32> to vector<1x128xf32>
    %151 = vector.broadcast %139 : f32 to vector<1x128xf32>
    %152 = arith.subf %150, %151 : vector<1x128xf32>
    %153 = vector.broadcast %149 : f32 to vector<1x128xf32>
    %154 = arith.mulf %152, %153 : vector<1x128xf32>
    %155 = math.floor %154 : vector<1x128xf32>
    %cst_42 = arith.constant 0.000000e+00 : f32
    %cst_43 = arith.constant 7.000000e+00 : f32
    %156 = vector.broadcast %cst_42 : f32 to vector<1x128xf32>
    %157 = arith.maximumf %156, %155 : vector<1x128xf32>
    %158 = vector.broadcast %cst_43 : f32 to vector<1x128xf32>
    %159 = arith.minimumf %158, %157 : vector<1x128xf32>
    %160 = arith.fptosi %159 : vector<1x128xf32> to vector<1x128xi32>
    %161 = arith.subf %143, %140 : f32
    %cst_44 = arith.constant 9.99999997E-7 : f32
    %162 = arith.maximumf %161, %cst_44 : f32
    %cst_45 = arith.constant 8.000000e+00 : f32
    %163 = arith.divf %cst_45, %162 : f32
    %164 = vector.extract_strided_slice %146 {offsets = [1, 0], sizes = [1, 128], strides = [1, 1]} : vector<8x128xf32> to vector<1x128xf32>
    %165 = vector.broadcast %140 : f32 to vector<1x128xf32>
    %166 = arith.subf %164, %165 : vector<1x128xf32>
    %167 = vector.broadcast %163 : f32 to vector<1x128xf32>
    %168 = arith.mulf %166, %167 : vector<1x128xf32>
    %169 = math.floor %168 : vector<1x128xf32>
    %cst_46 = arith.constant 0.000000e+00 : f32
    %cst_47 = arith.constant 7.000000e+00 : f32
    %170 = vector.broadcast %cst_46 : f32 to vector<1x128xf32>
    %171 = arith.maximumf %170, %169 : vector<1x128xf32>
    %172 = vector.broadcast %cst_47 : f32 to vector<1x128xf32>
    %173 = arith.minimumf %172, %171 : vector<1x128xf32>
    %174 = arith.fptosi %173 : vector<1x128xf32> to vector<1x128xi32>
    %175 = arith.subf %144, %141 : f32
    %cst_48 = arith.constant 9.99999997E-7 : f32
    %176 = arith.maximumf %175, %cst_48 : f32
    %cst_49 = arith.constant 8.000000e+00 : f32
    %177 = arith.divf %cst_49, %176 : f32
    %178 = vector.extract_strided_slice %146 {offsets = [2, 0], sizes = [1, 128], strides = [1, 1]} : vector<8x128xf32> to vector<1x128xf32>
    %179 = vector.broadcast %141 : f32 to vector<1x128xf32>
    %180 = arith.subf %178, %179 : vector<1x128xf32>
    %181 = vector.broadcast %177 : f32 to vector<1x128xf32>
    %182 = arith.mulf %180, %181 : vector<1x128xf32>
    %183 = math.floor %182 : vector<1x128xf32>
    %cst_50 = arith.constant 0.000000e+00 : f32
    %cst_51 = arith.constant 7.000000e+00 : f32
    %184 = vector.broadcast %cst_50 : f32 to vector<1x128xf32>
    %185 = arith.maximumf %184, %183 : vector<1x128xf32>
    %186 = vector.broadcast %cst_51 : f32 to vector<1x128xf32>
    %187 = arith.minimumf %186, %185 : vector<1x128xf32>
    %188 = arith.fptosi %187 : vector<1x128xf32> to vector<1x128xi32>
    %c64_i32_52 = arith.constant 64 : i32
    %189 = vector.broadcast %c64_i32_52 : i32 to vector<1x128xi32>
    %190 = arith.muli %160, %189 : vector<1x128xi32>
    %c8_i32_53 = arith.constant 8 : i32
    %191 = vector.broadcast %c8_i32_53 : i32 to vector<1x128xi32>
    %192 = arith.muli %174, %191 : vector<1x128xi32>
    %193 = arith.addi %190, %192 : vector<1x128xi32>
    %194 = arith.addi %193, %188 : vector<1x128xi32>
    %c0_i32_54 = arith.constant 0 : i32
    %195 = vector.broadcast %c0_i32_54 : i32 to vector<1x128xi32>
    %196 = arith.subi %194, %195 : vector<1x128xi32>
    %197 = vector.broadcast %196 : vector<1x128xi32> to vector<256x128xi32>
    %198 = arith.cmpi eq, %3, %197 : vector<256x128xi32>
    %199 = arith.extui %198 : vector<256x128xi1> to vector<256x128xi32>
    %200 = arith.sitofp %199 : vector<256x128xi32> to vector<256x128xf32>
    %cst_55 = arith.constant dense<0.000000e+00> : vector<8x256xf32>
    %201 = tpu.matmul %146, %200, %cst_55 {dimension_numbers = #tpu.dot_dimension_numbers<[1], [1], [0], [0], [0, 0, 1, 0], [], []>} : vector<8x128xf32>, vector<256x128xf32>, vector<8x256xf32> -> vector<8x256xf32>
    %c256_i32_56 = arith.constant 256 : i32
    %202 = vector.broadcast %c256_i32_56 : i32 to vector<1x128xi32>
    %203 = arith.subi %194, %202 : vector<1x128xi32>
    %204 = vector.broadcast %203 : vector<1x128xi32> to vector<256x128xi32>
    %205 = arith.cmpi eq, %3, %204 : vector<256x128xi32>
    %206 = arith.extui %205 : vector<256x128xi1> to vector<256x128xi32>
    %207 = arith.sitofp %206 : vector<256x128xi32> to vector<256x128xf32>
    %cst_57 = arith.constant dense<0.000000e+00> : vector<8x256xf32>
    %208 = tpu.matmul %146, %207, %cst_57 {dimension_numbers = #tpu.dot_dimension_numbers<[1], [1], [0], [0], [0, 0, 1, 0], [], []>} : vector<8x128xf32>, vector<256x128xf32>, vector<8x256xf32> -> vector<8x256xf32>
    %209 = tpu.concatenate %201, %208 in 1 : vector<8x256xf32>, vector<8x256xf32> -> vector<8x512xf32>
    %210 = vector.extract_strided_slice %209 {offsets = [6, 0], sizes = [1, 512], strides = [1, 1]} : vector<8x512xf32> to vector<1x512xf32>
    %cst_58 = arith.constant 0.000000e+00 : f32
    %211 = vector.broadcast %cst_58 : f32 to vector<1x512xf32>
    %212 = arith.cmpf ogt, %210, %211 : vector<1x512xf32>
    %213 = arith.extui %212 : vector<1x512xi1> to vector<1x512xi32>
    %214 = arith.sitofp %213 : vector<1x512xi32> to vector<1x512xf32>
    %cst_59 = arith.constant 1.000000e+00 : f32
    %215 = vector.broadcast %cst_59 : f32 to vector<1x512xf32>
    %216 = arith.maximumf %210, %215 : vector<1x512xf32>
    %217 = tpu.reciprocal %216 {approx = true} : vector<1x512xf32> -> vector<1x512xf32>
    %218 = vector.extract_strided_slice %209 {offsets = [0, 0], sizes = [6, 512], strides = [1, 1]} : vector<8x512xf32> to vector<6x512xf32>
    %219 = vector.broadcast %217 : vector<1x512xf32> to vector<6x512xf32>
    %220 = arith.mulf %218, %219 : vector<6x512xf32>
    %cst_60 = arith.constant 0.000000e+00 : f32
    %221 = vector.broadcast %cst_60 : f32 to vector<1x512xf32>
    %222 = vector.broadcast %2 : f32 to vector<1x512xf32>
    %223 = arith.addf %221, %222 : vector<1x512xf32>
    %c0_61 = arith.constant 0 : index
    %224 = memref.load %arg1[%c0_61] : memref<20xf32, #tpu.memory_space<smem>>
    %225 = vector.extract_strided_slice %220 {offsets = [0, 0], sizes = [1, 512], strides = [1, 1]} : vector<6x512xf32> to vector<1x512xf32>
    %226 = vector.broadcast %224 : f32 to vector<1x512xf32>
    %227 = arith.mulf %226, %225 : vector<1x512xf32>
    %228 = arith.addf %223, %227 : vector<1x512xf32>
    %c1_62 = arith.constant 1 : index
    %229 = memref.load %arg1[%c1_62] : memref<20xf32, #tpu.memory_space<smem>>
    %230 = vector.extract_strided_slice %220 {offsets = [1, 0], sizes = [1, 512], strides = [1, 1]} : vector<6x512xf32> to vector<1x512xf32>
    %231 = vector.broadcast %229 : f32 to vector<1x512xf32>
    %232 = arith.mulf %231, %230 : vector<1x512xf32>
    %233 = arith.addf %228, %232 : vector<1x512xf32>
    %c2_63 = arith.constant 2 : index
    %234 = memref.load %arg1[%c2_63] : memref<20xf32, #tpu.memory_space<smem>>
    %235 = vector.extract_strided_slice %220 {offsets = [2, 0], sizes = [1, 512], strides = [1, 1]} : vector<6x512xf32> to vector<1x512xf32>
    %236 = vector.broadcast %234 : f32 to vector<1x512xf32>
    %237 = arith.mulf %236, %235 : vector<1x512xf32>
    %238 = arith.addf %233, %237 : vector<1x512xf32>
    %c3_64 = arith.constant 3 : index
    %239 = memref.load %arg1[%c3_64] : memref<20xf32, #tpu.memory_space<smem>>
    %240 = vector.extract_strided_slice %220 {offsets = [3, 0], sizes = [1, 512], strides = [1, 1]} : vector<6x512xf32> to vector<1x512xf32>
    %241 = vector.broadcast %239 : f32 to vector<1x512xf32>
    %242 = arith.mulf %241, %240 : vector<1x512xf32>
    %243 = arith.addf %238, %242 : vector<1x512xf32>
    %c4_65 = arith.constant 4 : index
    %244 = memref.load %arg1[%c4_65] : memref<20xf32, #tpu.memory_space<smem>>
    %245 = vector.extract_strided_slice %220 {offsets = [4, 0], sizes = [1, 512], strides = [1, 1]} : vector<6x512xf32> to vector<1x512xf32>
    %246 = vector.broadcast %244 : f32 to vector<1x512xf32>
    %247 = arith.mulf %246, %245 : vector<1x512xf32>
    %248 = arith.addf %243, %247 : vector<1x512xf32>
    %c5_66 = arith.constant 5 : index
    %249 = memref.load %arg1[%c5_66] : memref<20xf32, #tpu.memory_space<smem>>
    %250 = vector.extract_strided_slice %220 {offsets = [5, 0], sizes = [1, 512], strides = [1, 1]} : vector<6x512xf32> to vector<1x512xf32>
    %251 = vector.broadcast %249 : f32 to vector<1x512xf32>
    %252 = arith.mulf %251, %250 : vector<1x512xf32>
    %253 = arith.addf %248, %252 : vector<1x512xf32>
    %c6_67 = arith.constant 6 : index
    %254 = memref.load %arg1[%c6_67] : memref<20xf32, #tpu.memory_space<smem>>
    %255 = vector.broadcast %254 : f32 to vector<1x512xf32>
    %256 = arith.mulf %255, %214 : vector<1x512xf32>
    %257 = arith.addf %253, %256 : vector<1x512xf32>
    %258 = tpu.concatenate %220, %214, %257 in 0 : vector<6x512xf32>, vector<1x512xf32>, vector<1x512xf32> -> vector<8x512xf32>
    %c1_68 = arith.constant 1 : index
    %c0_69 = arith.constant 0 : index
    %c0_70 = arith.constant 0 : index
    %259 = vector.load %arg5[%c1_68, %c0_69, %c0_70] : memref<2x8x512xf32, #tpu.memory_space<vmem>>, vector<1x8x512xf32>
    %260 = vector.shape_cast %259 : vector<1x8x512xf32> to vector<8x512xf32>
    %261 = vector.shape_cast %258 : vector<8x512xf32> to vector<1x8x512xf32>
    tpu.vector_store %arg5[%c1_68, %c0_69, %c0_70], %261 {strides = array<i32>} : memref<2x8x512xf32, #tpu.memory_space<vmem>>, vector<1x8x512xf32>,
    %cst_71 = arith.constant dense<0.000000e+00> : vector<1x8xf32>
    %262 = tpu.matmul %4, %258, %cst_71 {dimension_numbers = #tpu.dot_dimension_numbers<[1], [1], [0], [0], [0, 0, 1, 0], [], []>} : vector<1x512xf32>, vector<8x512xf32>, vector<1x8xf32> -> vector<1x8xf32>
    %cst_72 = arith.constant 0.001953125 : f32
    %263 = vector.broadcast %cst_72 : f32 to vector<1x8xf32>
    %264 = arith.mulf %262, %263 : vector<1x8xf32>
    %cst_73 = arith.constant dense<0.000000e+00> : vector<1x128xf32>
    %265 = tpu.matmul %264, %0, %cst_73 {dimension_numbers = #tpu.dot_dimension_numbers<[1], [0], [0], [1], [0, 0, 1, 1], [], []>} : vector<1x8xf32>, vector<8x128xf32>, vector<1x128xf32> -> vector<1x128xf32>
    %c1_74 = arith.constant 1 : index
    %c0_75 = arith.constant 0 : index
    %c0_76 = arith.constant 0 : index
    %266 = vector.load %arg3[%c1_74, %c0_75, %c0_76] : memref<2x1x32xf32, #tpu.memory_space<vmem>>, vector<1x1x32xf32>
    %267 = vector.shape_cast %266 : vector<1x1x32xf32> to vector<1x32xf32>
    %cst_77 = arith.constant dense<0.000000e+00> : vector<1x128xf32>
    %268 = tpu.matmul %267, %1, %cst_77 {dimension_numbers = #tpu.dot_dimension_numbers<[1], [0], [0], [1], [0, 0, 1, 1], [], []>} : vector<1x32xf32>, vector<32x128xf32>, vector<1x128xf32> -> vector<1x128xf32>
    %269 = arith.addf %265, %268 : vector<1x128xf32>
    %c1_78 = arith.constant 1 : index
    %c0_79 = arith.constant 0 : index
    %c0_80 = arith.constant 0 : index
    %270 = vector.load %arg6[%c1_78, %c0_79, %c0_80] : memref<2x1x128xf32, #tpu.memory_space<vmem>>, vector<1x1x128xf32>
    %271 = vector.shape_cast %270 : vector<1x1x128xf32> to vector<1x128xf32>
    %272 = vector.shape_cast %269 : vector<1x128xf32> to vector<1x1x128xf32>
    tpu.vector_store %arg6[%c1_78, %c0_79, %c0_80], %272 {strides = array<i32>} : memref<2x1x128xf32, #tpu.memory_space<vmem>>, vector<1x1x128xf32>,
    return
  }
  func.func @transform_0(%arg0: i32) -> i32 {
    %c0_i32 = arith.constant 0 : i32
    %c0_i32_0 = arith.constant 0 : i32
    return %c0_i32 : i32
  }
  func.func @transform_1(%arg0: i32) -> (i32, i32, i32) {
    %c0_i32 = arith.constant 0 : i32
    %c0_i32_0 = arith.constant 0 : i32
    %c0_i32_1 = arith.constant 0 : i32
    %c0_i32_2 = arith.constant 0 : i32
    return %c0_i32, %c0_i32_0, %c0_i32_1 : i32, i32, i32
  }
  func.func @transform_2(%arg0: i32) -> (i32, i32, i32) {
    %c0_i32 = arith.constant 0 : i32
    %c0_i32_0 = arith.constant 0 : i32
    %c0_i32_1 = arith.constant 0 : i32
    %c0_i32_2 = arith.constant 0 : i32
    return %c0_i32, %c0_i32_0, %c0_i32_1 : i32, i32, i32
  }
  func.func @transform_3(%arg0: i32) -> (i32, i32) {
    %c0_i32 = arith.constant 0 : i32
    %c0_i32_0 = arith.constant 0 : i32
    %c0_i32_1 = arith.constant 0 : i32
    return %c0_i32, %c0_i32_0 : i32, i32
  }
  func.func @transform_4(%arg0: i32) -> (i32, i32, i32) {
    %c0_i32 = arith.constant 0 : i32
    %c0_i32_0 = arith.constant 0 : i32
    %c0_i32_1 = arith.constant 0 : i32
    %c0_i32_2 = arith.constant 0 : i32
    return %c0_i32, %c0_i32_0, %c0_i32_1 : i32, i32, i32
  }
  func.func @transform_5(%arg0: i32) -> (i32, i32, i32) {
    %c0_i32 = arith.constant 0 : i32
    %c0_i32_0 = arith.constant 0 : i32
    %c0_i32_1 = arith.constant 0 : i32
    %c0_i32_2 = arith.constant 0 : i32
    return %c0_i32, %c0_i32_0, %c0_i32_1 : i32, i32, i32
  }
}

</mosaic_0001>

<bundles_post_ra>
// kernel: q_function_forward.1
= control target key start
LH: loop header
LB: loop body
LE: loop exit
PB: predicated region body
PF: predicated region fallthrough
CT: control target
= control target key end

     0   :  { %11 = vsyncpa [#allocation3], 0  ;;  %s3442_s0 = inlined_call_operand.vmem [shape: f32[20], index: 0, kind: input, shape index: {}]   ;;  %s3443_s1 = inlined_call_operand.vmem [shape: f32[2,8,128], index: 1, kind: input, shape index: {}]   ;;  %s3444_s2 = inlined_call_operand.vmem [shape: f32[2,1,32], index: 2, kind: input, shape index: {}]   ;;  %s3445_s3 = inlined_call_operand.vmem [shape: f32[40,128], index: 3, kind: input, shape index: {}]   ;;  %s3446_s4 = inlined_call_operand.vmem [shape: f32[2,8,512], index: 4, kind: output, shape index: {0}]   ;;  %s3447_s5 = inlined_call_operand.vmem [shape: f32[2,1,128], index: 5, kind: output, shape index: {1}]  }
   0x1   :  { %s18_s20 = sshll.u32 %s3442_s0, 4  ;;  %s19_s20 = int_to_ptr.vmem [resolvable:$true] %s18_s20 }
   0x2   :  { %s2566_s21 = scalar_lea.vmem %s19_s20, 16  ;;  %p2571_p1 = scmp.lt.s32.totalorder %s19_s20, %s19_s20 }
   0x3   :  { %p2567_p0 = scmp.ne.s32.totalorder %s19_s20, %s2566_s21  ;;  %p2572_p2 = scmp.lt.s32.totalorder %s2566_s21, %s2566_s21 }
   0x5   :  { %p2573_p3 = por %p2572_p2, %p2571_p1 }
   0x7   :  { %p2574_p4 = pnand %p2573_p3, %p2567_p0 }
   0x9   :  { %2577 = shalt.err (!%p2574_p4)
}
   0xa   :  { %s2580_s22 = smov [#allocation2]  }
   0xb   :  { %21 = dma.vmem_to_smem %s19_s20, 16, %s2580_s22, [#allocation3]  }
   0xc   :  { %2578 = dma.done.wait [#allocation3], 16  }
   0xd   :  { %2579 = vsyncadd [#allocation3], 4294967280 }
   0xe   :  { %31 = sfence }
   0xf   :  { %s2620_s23 = sld [smem:[#allocation2 + $0x8]]  ;;  %s1880_s24 = sld [smem:[#allocation2 + $0xb]]  ;;  %v2625_v0 = vld [vmem:[%s3443_s1] sm:$0xff]  ;;  %v38_v30 = vlaneseq  ;;  %v3450_v51 = vmov 1.0|1.0  }
  0x10   :  { %s2627_s0 = sld [smem:[#allocation2 + $0x9]]  ;;  %2210 = vmatprep.mubr.f32.mxu0 %v2625_v0  ;;  %2244 = vmatprep.mubr.f32.mxu1 %v2625_v0  ;;  %s1881_s27 = sld [smem:[#allocation2 + $0xc]] }
  0x11   :  { %s2631_s28 = sld [smem:[#allocation2 + $0xa]]  ;;  %s1882_s29 = sld [smem:[#allocation2 + $0xd]]  ;;  %v2645_v36 = vshrl.u32 %v38_v30, 7 }
  0x12   :  { %s2581_s6 = smov 1e-06   ;;  %s2912_s18 = sld [smem:[#allocation2 + $0xe]] }
  0x13   :  { %v2648_v41 = vsub.s32 0, %v2645_v36  ;;  %v2651_v43 = vadd.s32 128, %v2645_v36  ;;  %v2654_v44 = vadd.s32 136, %v2645_v36  ;;  %v2657_v45 = vadd.s32 8, %v2645_v36  ;;  %s2027_s19 = sld [smem:[#allocation2 + $0x11]]  ;;  %s2914_s20 = sld [smem:[#allocation2 + $0xf]] }
  0x14   :  { %v2660_v46 = vadd.s32 144, %v2645_v36  ;;  %v2663_v47 = vadd.s32 152, %v2645_v36  ;;  %v2698_v52 = vadd.s32 16, %v2645_v36  ;;  %v2701_v53 = vadd.s32 24, %v2645_v36  ;;  %s2028_s21 = sld [smem:[#allocation2 + $0x12]]  ;;  %s2923_s26 = sld [smem:[#allocation2 + $0x10]] }
  0x15   :  { %s78_s30 = ssub.f32 %s1880_s24, %s2620_s23  ;;  %v84_v7 = vstv %s2620_s23  ;;  %v2705_v54 = vadd.s32 160, %v2645_v36  ;;  %v2708_v55 = vadd.s32 168, %v2645_v36  ;;  %v2731_v56 = vadd.s32 32, %v2645_v36  ;;  %s511_s23 = sld [smem:[#allocation2]] }
  0x16   :  { %s92_s8 = ssub.f32 %s1881_s27, %s2627_s0  ;;  %v98_v8 = vstv %s2627_s0  ;;  %v85_v9 = vsub.f32 %v2625_v0, %v84_v7  ;;  %v2734_v57 = vadd.s32 40, %v2645_v36  ;;  %v2738_v58 = vadd.s32 176, %v2645_v36  ;;  %s2029_s0 = sld [smem:[#allocation2 + $0x13]] }
  0x17   :  { %s79_s7 = smax.f32 %s2581_s6, %s78_s30  ;;  %s106_s9 = ssub.f32 %s1882_s29, %s2631_s28  ;;  %v112_v10 = vstv %s2631_s28  ;;  %v99_v11 = vsub.f32 %v2625_v0, %v98_v8  ;;  %v2741_v59 = vadd.s32 184, %v2645_v36  ;;  %v2763_v60 = vadd.s32 48, %v2645_v36 }
  0x18   :  { %v80_v1 = vstv %s79_s7  ;;  %s93_s10 = smax.f32 %s2581_s6, %s92_s8  ;;  %v113_v13 = vsub.f32 %v2625_v0, %v112_v10  ;;  %v2766_v61 = vadd.s32 56, %v2645_v36  ;;  %v2770_v62 = vadd.s32 192, %v2645_v36  ;;  %s2016_s24 = sld [smem:[#allocation2 + $0x1]] }
  0x19   :  { %2538 = vrcp.f32 %v80_v1  ;;  %v94_v2 = vstv %s93_s10  ;;  %s107_s11 = smax.f32 %s2581_s6, %s106_s9  ;;  %3498 = vst [vmem:[#allocation5_spill] sm:$0xff] %v2763_v60  ;;  %v2773_v63 = vadd.s32 200, %v2645_v36  ;;  %v2795_v1 = vadd.s32 64, %v2645_v36  ;;  %s978_s7 = ssub.f32 %s2027_s19, %s2912_s18 }
  0x1a   :  { %2540 = vrcp.f32 %v94_v2  ;;  %v108_v3 = vstv %s107_s11  ;;  %3499 = vst [vmem:[#allocation6_spill] sm:$0xff] %v2766_v61  ;;  %3500 = vst [vmem:[#allocation7_spill] sm:$0xff] %v2770_v62  ;;  %v2798_v2 = vadd.s32 72, %v2645_v36  ;;  %v2834_v7 = vadd.s32 224, %v2645_v36  ;;  %s992_s8 = ssub.f32 %s2028_s21, %s2914_s20  ;;  %s2960_s19 = sld [smem:[#allocation2 + $0x6]] }
  0x1b   :  { %2542 = vrcp.f32 %v108_v3  ;;  %3501 = vst [vmem:[#allocation8_spill] sm:$0xff] %v2773_v63  ;;  %3502 = vst [vmem:[#allocation9_spill] sm:$0xff] %v2795_v1  ;;  %v2802_v3 = vadd.s32 208, %v2645_v36  ;;  %v2837_v8 = vadd.s32 232, %v2645_v36  ;;  %v2862_v10 = vadd.s32 104, %v2645_v36  ;;  %s979_s9 = smax.f32 %s2581_s6, %s978_s7  ;;  %s2982_s25 = sld [smem:[#allocation2 + $0x2]] }
  0x1c   :  { %3503 = vst [vmem:[#allocation10_spill] sm:$0xff] %v2798_v2  ;;  %3508 = vst [vmem:[#allocation15_spill] sm:$0xff] %v2834_v7  ;;  %s1006_s10 = ssub.f32 %s2029_s0, %s2923_s26  ;;  %s2987_s0 = sld [smem:[#allocation2 + $0x4]] }
  0x1d   :  { %3504 = vst [vmem:[#allocation11_spill] sm:$0xff] %v2802_v3  ;;  %3509 = vst [vmem:[#allocation16_spill] sm:$0xff] %v2837_v8  ;;  %s2989_s27 = sld [smem:[#allocation2 + $0x5]] }
  0x1e   :  { %3511 = vst [vmem:[#allocation18_spill] sm:$0xff] %v2862_v10 }
  0x23   :  { %v2539_v4 = vpop.eup %2538 }
  0x24   :  { %2507 = vpush %v2539_v4  ;;  %v2541_v5 = vpop.eup %2540  ;;  %v2805_v4 = vadd.s32 216, %v2645_v36 }
  0x25   :  { %v2543_v6 = vpop.eup %2542  ;;  %2511 = vpush %v2541_v5  ;;  %v2827_v5 = vadd.s32 80, %v2645_v36 }
  0x26   :  { %2515 = vpush %v2543_v6  ;;  %3505 = vst [vmem:[#allocation12_spill] sm:$0xff] %v2805_v4  ;;  %v2830_v6 = vadd.s32 88, %v2645_v36 }
  0x27   :  { %3506 = vst [vmem:[#allocation13_spill] sm:$0xff] %v2827_v5 }
  0x28   :  { %3507 = vst [vmem:[#allocation14_spill] sm:$0xff] %v2830_v6 }
  0x55   :  { %s2508_s12 = spop %2507 }
  0x56   :  { %s83_s13 = smul.f32 8.0, %s2508_s12  ;;  %s2512_s14 = spop %2511 }
  0x57   :  { %s97_s15 = smul.f32 8.0, %s2512_s14  ;;  %s2516_s16 = spop %2515 }
  0x58   :  { %v86_v12 = vstv %s83_s13  ;;  %s111_s17 = smul.f32 8.0, %s2516_s16  ;;  %s993_s13 = smax.f32 %s2581_s6, %s992_s8 }
  0x59   :  { %v87_v14 = vmul.f32 %v86_v12, %v85_v9  ;;  %v100_v15 = vstv %s97_s15  ;;  %v2859_v9 = vadd.s32 96, %v2645_v36  ;;  %v2869_v12 = vadd.s32 248, %v2645_v36  ;;  %s1007_s14 = smax.f32 %s2581_s6, %s1006_s10 }
  0x5a   :  { %v101_v17 = vmul.f32 %v100_v15, %v99_v11  ;;  %v114_v18 = vstv %s111_s17  ;;  %v2866_v11 = vadd.s32 240, %v2645_v36  ;;  %v3452_v15 = vmov 1.0  }
  0x5b   :  { %v88_v16 = vfloor.f32 %v87_v14  ;;  %v115_v19 = vmul.f32 %v114_v18, %v113_v13  ;;  %3510 = vst [vmem:[#allocation17_spill] sm:$0xff] %v2859_v9  ;;  %3513 = vst [vmem:[#allocation20_spill] sm:$0xff] %v2869_v12  ;;  %v2891_v13 = vadd.s32 112, %v2645_v36  ;;  %v2894_v14 = vadd.s32 120, %v2645_v36 }
  0x5c   :  { %v102_v21 = vfloor.f32 %v101_v17  ;;  %3512 = vst [vmem:[#allocation19_spill] sm:$0xff] %v2866_v11  ;;  %v33_v17 = vld [vmem:[%s3445_s3 + $0x8] sm:$0xff] }
  0x5d   :  { %v89_v20 = vmax.f32 %v88_v16, 0.0  ;;  %v116_v22 = vfloor.f32 %v115_v19  ;;  %3514 = vst [vmem:[#allocation21_spill] sm:$0xff] %v2891_v13  ;;  %3515 = vst [vmem:[#allocation22_spill] sm:$0xff] %v2894_v14  ;;  %v3448_v16 = vmov 0.0|0.0   ;;  %v35_v19 = vld [vmem:[%s3445_s3 + $0x18] sm:$0xff] }
  0x5e   :  { %v103_v24 = vmax.f32 %v102_v21, 0.0 }
  0x5f   :  { %v90_v23 = vmin.f32 %v89_v20, 7.0  ;;  %v117_v25 = vmax.f32 %v116_v22, 0.0  ;;  %v36_v20 = vld [vmem:[%s3445_s3 + $0x20] sm:$0xff]  ;;  %v3454_v22 = vmov 0.0  }
  0x60   :  { %v104_v27 = vmin.f32 %v103_v24, 7.0  ;;  %v2934_v21 = vpack.c.bf16 %v36_v20, %v35_v19  ;;  %v980_v24 = vstv %s979_s9 }
  0x61   :  { %v2509_v26 = vtrunc.f32 %v90_v23  ;;  %v118_v28 = vmin.f32 %v117_v25, 7.0  ;;  %v820_v23 = vld [vmem:[%s3444_s2] sm:$0x1]  ;;  %2544 = vrcp.f32 %v980_v24  ;;  %v994_v25 = vstv %s993_s13 }
  0x62   :  { %v2513_v29 = vtrunc.f32 %v104_v27  ;;  %3517 = vst [vmem:[#allocation24_spill] sm:$0xff] %v2934_v21  ;;  %2546 = vrcp.f32 %v994_v25  ;;  %v2952_v27 = vld [vmem:[%s3443_s1 + $0x8] sm:$0xff] }
  0x63   :  { %v2517_v31 = vtrunc.f32 %v118_v28  ;;  %v2510_v32 = vcvt.f32.s32 %v2509_v26  ;;  %v1008_v26 = vstv %s1007_s14  ;;  %3518 = vst [vmem:[#allocation25_spill] sm:$0xff] %v2952_v27 }
  0x64   :  { %v2514_v33 = vcvt.f32.s32 %v2513_v29  ;;  %2548 = vrcp.f32 %v1008_v26  ;;  %v2996_v26 = vstv %s2960_s19 }
  0x65   :  { %v2518_v34 = vcvt.f32.s32 %v2517_v31  ;;  %v120_v37 = vmul.u32 64, %v2510_v32  ;;  %v984_v31 = vstv %s2912_s18  ;;  %s2973_s18 = sld [smem:[#allocation2 + $0x7]] }
  0x66   :  { %v121_v35 = vmul.u32 8, %v2514_v33  ;;  %v985_v32 = vsub.f32 %v2952_v27, %v984_v31 }
  0x67   :  { %v124_v39 = vrot.slane %v2518_v34, 2  ;;  %v998_v34 = vstv %s2914_s20 }
  0x68   :  { %v122_v38 = vrot.slane %v121_v35, 1 }
  0x6a   :  { %v123_v40 = vadd.s32 %v122_v38, %v120_v37 }
  0x6b   :  { %v2545_v28 = vpop.eup %2544 }
  0x6c   :  { %v125_v42 = vadd.s32 %v124_v39, %v123_v40  ;;  %v2547_v29 = vpop.eup %2546  ;;  %2519 = vpush %v2545_v28  ;;  %v1012_v40 = vstv %s2923_s26  ;;  %s2984_s26 = sld [smem:[#allocation2 + $0x3]] }
  0x6d   :  { %2523 = vpush %v2547_v29  ;;  %v1013_v20 = vsub.f32 %v2952_v27, %v1012_v40 }
  0x6e   :  { %v2666_v48 = vrot.slane %v125_v42, %v2648_v41  ;;  %v1947_v49 = vadd.s32 4294967040, %v125_v42  ;;  %v2549_v30 = vpop.eup %2548 }
  0x6f   :  { %2527 = vpush %v2549_v30 }
  0x70   :  { %v2669_v50 = vrot.slane %v1947_v49, %v2648_v41  ;;  %vm146_vm0 = vcmp.eq.s32.totalorder %v2651_v43, %v2666_v48  ;;  %vm147_vm1 = vcmp.eq.s32.totalorder %v2654_v44, %v2666_v48  ;;  %vm130_vm2 = vcmp.eq.s32.totalorder %v2645_v36, %v2666_v48 }
  0x71   :  { %vm2360_vm3 = vmpackc.low %vm147_vm1, %vm146_vm0  ;;  %vm131_vm4 = vcmp.eq.s32.totalorder %v2657_v45, %v2666_v48  ;;  %vm148_vm5 = vcmp.eq.s32.totalorder %v2660_v46, %v2666_v48  ;;  %vm149_vm6 = vcmp.eq.s32.totalorder %v2663_v47, %v2666_v48  ;;  %v999_v49 = vsub.f32 %v2952_v27, %v998_v34 }
  0x72   :  { %2361 = vmatprep.subr.msk.bf16.mxu0 %vm2360_vm3, %v3450_v51  ;;  %vm2362_vm7 = vmpackc.low %vm131_vm4, %vm130_vm2  ;;  %vm318_vm8 = vcmp.eq.s32.totalorder %v2651_v43, %v2669_v50  ;;  %vm319_vm9 = vcmp.eq.s32.totalorder %v2654_v44, %v2669_v50  ;;  %vm302_vm10 = vcmp.eq.s32.totalorder %v2645_v36, %v2669_v50  ;;  %vm303_vm11 = vcmp.eq.s32.totalorder %v2657_v45, %v2669_v50 }
  0x73   :  { %2363 = vmatpush3.bf16.xpose.msk.msra.mxu0 %vm2362_vm7, %v3450_v51  ;;  %vm2364_vm12 = vmpackc.low %vm149_vm6, %vm148_vm5  ;;  %vm320_vm13 = vcmp.eq.s32.totalorder %v2660_v46, %v2669_v50  ;;  %vm321_vm14 = vcmp.eq.s32.totalorder %v2663_v47, %v2669_v50  ;;  %vm132_vm2 = vcmp.eq.s32.totalorder %v2698_v52, %v2666_v48  ;;  %vm133_vm3 = vcmp.eq.s32.totalorder %v2701_v53, %v2666_v48 }
  0x74   :  { %2365 = vmatprep.subr.msk.bf16.mxu0 %vm2364_vm12, %v3450_v51  ;;  %vm2392_vm15 = vmpackc.low %vm319_vm9, %vm318_vm8  ;;  %vm150_vm4 = vcmp.eq.s32.totalorder %v2705_v54, %v2666_v48  ;;  %vm151_vm5 = vcmp.eq.s32.totalorder %v2708_v55, %v2666_v48  ;;  %vm304_vm7 = vcmp.eq.s32.totalorder %v2698_v52, %v2669_v50  ;;  %vm305_vm8 = vcmp.eq.s32.totalorder %v2701_v53, %v2669_v50 }
  0x75   :  { %2393 = vmatprep.subr.msk.bf16.mxu1 %vm2392_vm15, %v3450_v51  ;;  %vm2394_vm0 = vmpackc.low %vm303_vm11, %vm302_vm10  ;;  %vm322_vm10 = vcmp.eq.s32.totalorder %v2705_v54, %v2669_v50  ;;  %vm323_vm11 = vcmp.eq.s32.totalorder %v2708_v55, %v2669_v50  ;;  %vm135_vm15 = vcmp.eq.s32.totalorder %v2734_v57, %v2666_v48  ;;  %v3002_v34 = vsub.s32 6, %v2645_v36 }
  0x76   :  { %2395 = vmatpush3.bf16.xpose.msk.msra.mxu1 %vm2394_vm0, %v3450_v51  ;;  %vm2396_vm1 = vmpackc.low %vm321_vm14, %vm320_vm13  ;;  %vm134_vm14 = vcmp.eq.s32.totalorder %v2731_v56, %v2666_v48  ;;  %vm152_vm0 = vcmp.eq.s32.totalorder %v2738_v58, %v2666_v48 }
  0x77   :  { %2397 = vmatprep.subr.msk.bf16.mxu1 %vm2396_vm1, %v3450_v51  ;;  %vm2366_vm6 = vmpackc.low %vm133_vm3, %vm132_vm2  ;;  %vm153_vm1 = vcmp.eq.s32.totalorder %v2741_v59, %v2666_v48  ;;  %vm306_vm3 = vcmp.eq.s32.totalorder %v2731_v56, %v2669_v50  ;;  %3519 = vst [vmem:[#allocation26_spill] sm:$0xff] %v3002_v34 }
  0x78   :  { %vm2368_vm9 = vmpackc.low %vm151_vm5, %vm150_vm4  ;;  %vm307_vm4 = vcmp.eq.s32.totalorder %v2734_v57, %v2669_v50 }
  0x79   :  { %vm2398_vm12 = vmpackc.low %vm305_vm8, %vm304_vm7  ;;  %vm325_vm7 = vcmp.eq.s32.totalorder %v2741_v59, %v2669_v50 }
  0x7a   :  { %vm2400_vm13 = vmpackc.low %vm323_vm11, %vm322_vm10  ;;  %vm136_vm10 = vcmp.eq.s32.totalorder %v2763_v60, %v2666_v48  ;;  %vm137_vm11 = vcmp.eq.s32.totalorder %v2766_v61, %v2666_v48 }
  0x7b   :  { %2367 = vmatpush3.bf16.xpose.msk.msra.mxu0 %vm2366_vm6, %v3450_v51  ;;  %vm2370_vm2 = vmpackc.low %vm135_vm15, %vm134_vm14  ;;  %vm324_vm6 = vcmp.eq.s32.totalorder %v2738_v58, %v2669_v50  ;;  %vm308_vm15 = vcmp.eq.s32.totalorder %v2763_v60, %v2669_v50 }
  0x7c   :  { %2369 = vmatprep.subr.msk.bf16.mxu0 %vm2368_vm9, %v3450_v51  ;;  %vm2372_vm5 = vmpackc.low %vm153_vm1, %vm152_vm0  ;;  %vm309_vm0 = vcmp.eq.s32.totalorder %v2766_v61, %v2669_v50 }
  0x7d   :  { %vm2402_vm8 = vmpackc.low %vm307_vm4, %vm306_vm3  ;;  %vm327_vm3 = vcmp.eq.s32.totalorder %v2773_v63, %v2669_v50 }
  0x7e   :  { %2399 = vmatpush3.bf16.xpose.msk.msra.mxu1 %vm2398_vm12, %v3450_v51  ;;  %vm2404_vm9 = vmpackc.low %vm325_vm7, %vm324_vm6  ;;  %vm154_vm12 = vcmp.eq.s32.totalorder %v2770_v62, %v2666_v48  ;;  %vm138_vm6 = vcmp.eq.s32.totalorder %v2795_v1, %v2666_v48  ;;  %vm139_vm7 = vcmp.eq.s32.totalorder %v2798_v2, %v2666_v48 }
  0x7f   :  { %2401 = vmatprep.subr.msk.bf16.mxu1 %vm2400_vm13, %v3450_v51  ;;  %vm155_vm13 = vcmp.eq.s32.totalorder %v2773_v63, %v2666_v48  ;;  %vm2374_vm14 = vmpackc.low %vm137_vm11, %vm136_vm10  ;;  %vm310_vm11 = vcmp.eq.s32.totalorder %v2795_v1, %v2669_v50 }
  0x80   :  { %vm2376_vm1 = vmpackc.low %vm155_vm13, %vm154_vm12  ;;  %vm311_vm12 = vcmp.eq.s32.totalorder %v2798_v2, %v2669_v50 }
  0x81   :  { %vm2406_vm4 = vmpackc.low %vm309_vm0, %vm308_vm15  ;;  %vm329_vm15 = vcmp.eq.s32.totalorder %v2805_v4, %v2669_v50 }
  0x82   :  { %vm2378_vm10 = vmpackc.low %vm139_vm7, %vm138_vm6  ;;  %vm312_vm7 = vcmp.eq.s32.totalorder %v2827_v5, %v2669_v50 }
  0x83   :  { %2371 = vmatpush3.bf16.xpose.msk.msra.mxu0 %vm2370_vm2, %v3450_v51  ;;  %vm326_vm2 = vcmp.eq.s32.totalorder %v2770_v62, %v2669_v50  ;;  %vm2410_vm0 = vmpackc.low %vm311_vm12, %vm310_vm11  ;;  %vm331_vm11 = vcmp.eq.s32.totalorder %v2837_v8, %v2669_v50 }
  0x84   :  { %2373 = vmatprep.subr.msk.bf16.mxu0 %vm2372_vm5, %v3450_v51  ;;  %vm2408_vm5 = vmpackc.low %vm327_vm3, %vm326_vm2  ;;  %vm140_vm2 = vcmp.eq.s32.totalorder %v2827_v5, %v2666_v48  ;;  %vm141_vm3 = vcmp.eq.s32.totalorder %v2830_v6, %v2666_v48 }
  0x85   :  { %vm2382_vm6 = vmpackc.low %vm141_vm3, %vm140_vm2  ;;  %vm314_vm3 = vcmp.eq.s32.totalorder %v2859_v9, %v2669_v50 }
  0x86   :  { %2403 = vmatpush3.bf16.xpose.msk.msra.mxu1 %vm2402_vm8, %v3450_v51  ;;  %vm156_vm8 = vcmp.eq.s32.totalorder %v2802_v3, %v2666_v48 }
  0x87   :  { %2405 = vmatprep.subr.msk.bf16.mxu1 %vm2404_vm9, %v3450_v51  ;;  %vm157_vm9 = vcmp.eq.s32.totalorder %v2805_v4, %v2666_v48 }
  0x88   :  { %vm2380_vm13 = vmpackc.low %vm157_vm9, %vm156_vm8  ;;  %vm313_vm8 = vcmp.eq.s32.totalorder %v2830_v6, %v2669_v50 }
  0x89   :  { %vm2414_vm12 = vmpackc.low %vm313_vm8, %vm312_vm7  ;;  %vm333_vm7 = vcmp.eq.s32.totalorder %v2869_v12, %v2669_v50 }
  0x8b   :  { %2375 = vmatpush3.bf16.xpose.msk.msra.mxu0 %vm2374_vm14, %v3450_v51  ;;  %vm328_vm14 = vcmp.eq.s32.totalorder %v2802_v3, %v2669_v50 }
  0x8c   :  { %2377 = vmatprep.subr.msk.bf16.mxu0 %vm2376_vm1, %v3450_v51  ;;  %vm2412_vm1 = vmpackc.low %vm329_vm15, %vm328_vm14  ;;  %vm142_vm14 = vcmp.eq.s32.totalorder %v2859_v9, %v2666_v48  ;;  %vm143_vm15 = vcmp.eq.s32.totalorder %v2862_v10, %v2666_v48 }
  0x8d   :  { %vm2386_vm2 = vmpackc.low %vm143_vm15, %vm142_vm14  ;;  %vm317_vm14 = vcmp.eq.s32.totalorder %v2894_v14, %v2669_v50 }
  0x8e   :  { %2407 = vmatpush3.bf16.xpose.msk.msra.mxu1 %vm2406_vm4, %v3450_v51  ;;  %vm158_vm4 = vcmp.eq.s32.totalorder %v2834_v7, %v2666_v48 }
  0x8f   :  { %2409 = vmatprep.subr.msk.bf16.mxu1 %vm2408_vm5, %v3450_v51  ;;  %vm159_vm5 = vcmp.eq.s32.totalorder %v2837_v8, %v2666_v48 }
  0x90   :  { %vm2384_vm9 = vmpackc.low %vm159_vm5, %vm158_vm4  ;;  %vm315_vm4 = vcmp.eq.s32.totalorder %v2862_v10, %v2669_v50 }
  0x91   :  { %vm2418_vm8 = vmpackc.low %vm315_vm4, %vm314_vm3 }
  0x93   :  { %2379 = vmatpush3.bf16.xpose.msk.msra.mxu0 %vm2378_vm10, %v3450_v51  ;;  %vm330_vm10 = vcmp.eq.s32.totalorder %v2834_v7, %v2669_v50 }
  0x94   :  { %2381 = vmatprep.subr.msk.bf16.mxu0 %vm2380_vm13, %v3450_v51  ;;  %vm2416_vm13 = vmpackc.low %vm331_vm11, %vm330_vm10  ;;  %vm144_vm10 = vcmp.eq.s32.totalorder %v2891_v13, %v2666_v48  ;;  %vm145_vm11 = vcmp.eq.s32.totalorder %v2894_v14, %v2666_v48 }
  0x96   :  { %2411 = vmatpush3.bf16.xpose.msk.msra.mxu1 %vm2410_vm0, %v3450_v51  ;;  %vm160_vm0 = vcmp.eq.s32.totalorder %v2866_v11, %v2666_v48 }
  0x97   :  { %2413 = vmatprep.subr.msk.bf16.mxu1 %vm2412_vm1, %v3450_v51  ;;  %vm161_vm1 = vcmp.eq.s32.totalorder %v2869_v12, %v2666_v48  ;;  %v3520_v12 = vmov 0.0  }
  0x98   :  { %vm2388_vm5 = vmpackc.low %vm161_vm1, %vm160_vm0  ;;  %vm2585_vm0 = vmmov 0   ;;  %vm821_vm1 = vcmask 261120  }
  0x9b   :  { %2383 = vmatpush3.bf16.xpose.msk.msra.mxu0 %vm2382_vm6, %v3450_v51  ;;  %vm332_vm6 = vcmp.eq.s32.totalorder %v2866_v11, %v2669_v50 }
  0x9c   :  { %2385 = vmatprep.subr.msk.bf16.mxu0 %vm2384_vm9, %v3450_v51  ;;  %vm2420_vm9 = vmpackc.low %vm333_vm7, %vm332_vm6  ;;  %vm665_vm6 = vcmask 1045504   ;;  %vm670_vm7 = vcmask 1046528  }
  0x9d   :  { %s2520_s6 = spop %2519 }
  0x9e   :  { %2415 = vmatpush3.bf16.xpose.msk.msra.mxu1 %vm2414_vm12, %v3450_v51  ;;  %vm2390_vm12 = vmpackc.low %vm145_vm11, %vm144_vm10  ;;  %s983_s17 = smul.f32 8.0, %s2520_s6  ;;  %s2524_s1 = spop %2523 }
  0x9f   :  { %2417 = vmatprep.subr.msk.bf16.mxu1 %vm2416_vm13, %v3450_v51  ;;  %vm316_vm13 = vcmp.eq.s32.totalorder %v2891_v13, %v2669_v50  ;;  %s997_s21 = smul.f32 8.0, %s2524_s1 }
  0xa0   :  { %vm2422_vm15 = vmpackc.low %vm317_vm14, %vm316_vm13  ;;  %v986_v38 = vstv %s983_s17  ;;  %s2966_s22 = spop %2527 }
  0xa1   :  { %v987_v48 = vmul.f32 %v986_v38, %v985_v32  ;;  %s1011_s20 = smul.f32 8.0, %s2966_s22 }
  0xa3   :  { %2387 = vmatpush3.bf16.xpose.msk.msra.mxu0 %vm2386_vm2, %v3450_v51  ;;  %v1014_v28 = vstv %s1011_s20 }
  0xa4   :  { %2389 = vmatprep.subr.msk.bf16.mxu0 %vm2388_vm5, %v3450_v51  ;;  %v1015_v32 = vmul.f32 %v1014_v28, %v1013_v20  ;;  %v3020_v20 = vstv %s2016_s24 }
  0xa6   :  { %2419 = vmatpush3.bf16.xpose.msk.msra.mxu1 %vm2418_vm8, %v3450_v51  ;;  %v1016_v40 = vfloor.f32 %v1015_v32  ;;  %v3031_v32 = vstv %s2984_s26 }
  0xa7   :  { %2421 = vmatprep.subr.msk.bf16.mxu1 %vm2420_vm9, %v3450_v51 }
  0xab   :  { %2391 = vmatpush3.bf16.xpose.msk.msra.mxu0 %vm2390_vm12, %v3450_v51 }
  0xae   :  { %2423 = vmatpush3.bf16.xpose.msk.msra.mxu1 %vm2422_vm15, %v3450_v51  ;;  %v3038_v51 = vstv %s2989_s27 }
  0xaf   :  { %2424 = vmatprep.subr.bf16.mxu1 %v3448_v16 }
  0xb2   :  { %2211 = vmatmul.mubr.f32.vlgmr.msra.gmra.mrb[0].mxu0 %v2625_v0 }
  0xb3   :  { %743 = vmatprep.mubr.f32.mxu0 %v3452_v15 }
  0xb5   :  { %2245 = vmatmul.mubr.f32.vlgmr.msra.gmra.mrb[0].mxu1 %v2625_v0  ;;  %v34_v0 = vld [vmem:[%s3445_s3 + $0x10] sm:$0xff] }
  0xb6   :  { %v2925_v18 = vpack.c.bf16 %v34_v0, %v33_v17  ;;  %2336 = vmatprep.mubr.msk.f32.mxu1 %vm2585_vm0, %v3454_v22  ;;  %v1000_v0 = vstv %s997_s21 }
  0xb7   :  { %v1001_v24 = vmul.f32 %v1000_v0, %v999_v49 }
  0xb8   :  { %3516 = vst [vmem:[#allocation23_spill] sm:$0xff] %v2925_v18  ;;  %2426 = vmatpush3.bf16.msra.mxu1 %v2925_v18 }
  0xb9   :  { %2427 = vmatprep.subr.bf16.mxu1 %v3448_v16  ;;  %v1002_v31 = vfloor.f32 %v1001_v24  ;;  %v3035_v16 = vstv %s2987_s0 }
  0xbc   :  { %2429 = vmatpush3.bf16.msra.mxu1 %v2934_v21 }
  0xbf   :  { %2337 = vmatmul.mubr.msk.f32.vlgmr.msra.gmra.mrb[2].mxu1 %vm821_vm1, %v820_v23  ;;  %v988_v23 = vfloor.f32 %v987_v48  ;;  %v3008_v48 = vstv %s2973_s18 }
  0xc0   :  { %2319 = vmatprep.mubr.f32.mxu1 %v2952_v27 }
  0xc1   :  { %v989_v30 = vmax.f32 %v988_v23, 0.0 }
  0xc3   :  { %v990_v38 = vmin.f32 %v989_v30, 7.0 }
  0xc5   :  { %v2521_v24 = vtrunc.f32 %v990_v38 }
 0x185   :  { %v2958_v33 = vpop.f32.mrb[0].mxu0 }
 0x186   :  { %v481_v35 = vmax.f32 %v2958_v33, 1.0  ;;  %v2964_v37 = vpop.f32.mrb[1].mxu0  ;;  %vm469_vm2 = vcmp.gt.f32.partialorder %v2958_v33, 0.0 }
 0x187   :  { %v482_v39 = vmax.f32 %v2964_v37, 1.0  ;;  %vm470_vm3 = vcmp.gt.f32.partialorder %v2964_v37, 0.0  ;;  %v2993_v25 = vsel %vm469_vm2, 1.0, %v3454_v22 }
 0x188   :  { %2550 = vrcp.f32 %v481_v35  ;;  %v2970_v42 = vpop.f32.mrb[0].mxu1  ;;  %v2999_v29 = vsel %vm470_vm3, 1.0, %v3454_v22  ;;  %v3012_v49 = vmul.f32 %v2993_v25, %v2996_v26 }
 0x189   :  { %2552 = vrcp.f32 %v482_v39  ;;  %v483_v50 = vmax.f32 %v2970_v42, 1.0  ;;  %v2976_v17 = vpop.f32.mrb[1].mxu1  ;;  %vm471_vm4 = vcmp.gt.f32.partialorder %v2970_v42, 0.0  ;;  %v1003_v39 = vmax.f32 %v1002_v31, 0.0 }
 0x18a   :  { %v484_v19 = vmax.f32 %v2976_v17, 1.0  ;;  %v3005_v35 = vsel %vm471_vm4, 1.0, %v3454_v22  ;;  %v3028_v31 = vstv %s2982_s25  ;;  %vm472_vm5 = vcmp.gt.f32.partialorder %v2976_v17, 0.0 }
 0x18b   :  { %2554 = vrcp.f32 %v483_v50  ;;  %v3016_v50 = vmul.f32 %v2999_v29, %v2996_v26  ;;  %v3024_v23 = vmul.f32 %v3005_v35, %v2996_v26  ;;  %v1004_v15 = vmin.f32 %v1003_v39, 7.0 }
 0x18c   :  { %2556 = vrcp.f32 %v484_v19  ;;  %v3018_v19 = vstv %s511_s23  ;;  %v3040_v22 = vmax.f32 %v1016_v40, 0.0  ;;  %v3051_v11 = vsel %vm472_vm5, 1.0, %v3520_v12 }
 0x18d   :  { %v2522_v39 = vcvt.f32.s32 %v2521_v24  ;;  %v3066_v24 = vtrunc.f32 %v1004_v15 }
 0x192   :  { %v2551_v0 = vpop.eup %2550 }
 0x193   :  { %v2553_v28 = vpop.eup %2552  ;;  %v492_v30 = vrot.slane %v2551_v0, %v3002_v34 }
 0x194   :  { %v496_v0 = vrot.slane %v2553_v28, %v3002_v34 }
 0x195   :  { %v2555_v21 = vpop.eup %2554  ;;  %v3043_v18 = vmul.f32 %v492_v30, %v2958_v33 }
 0x196   :  { %v500_v14 = vrot.slane %v2555_v21, %v3002_v34  ;;  %v2557_v40 = vpop.eup %2556  ;;  %v3073_v7 = vmul.f32 %v496_v0, %v2964_v37 }
 0x197   :  { %v513_v10 = vmul.f32 %v3018_v19, %v3043_v18  ;;  %v523_v33 = vmul.f32 %v3020_v20, %v3043_v18  ;;  %v545_v28 = vmul.f32 %v3028_v31, %v3043_v18  ;;  %v567_v30 = vmul.f32 %v3031_v32, %v3043_v18 }
 0x198   :  { %v589_v21 = vmul.f32 %v3035_v16, %v3043_v18  ;;  %v3064_v27 = vmul.f32 %v500_v14, %v2970_v42  ;;  %v611_v8 = vmul.f32 %v3038_v51, %v3043_v18  ;;  %v504_v15 = vrot.slane %v2557_v40, %v3002_v34 }
 0x199   :  { %v517_v38 = vadd.f32 %v513_v10, %v3008_v48  ;;  %v531_v9 = vrot.slane %v523_v33, 1  ;;  %v3080_v42 = vmul.u32 64, %v2522_v39  ;;  %v553_v5 = vrot.slane %v545_v28, 2 }
 0x19a   :  { %v515_v6 = vmul.f32 %v3018_v19, %v3064_v27  ;;  %v525_v14 = vmul.f32 %v3020_v20, %v3064_v27  ;;  %v575_v10 = vrot.slane %v567_v30, 3  ;;  %v547_v33 = vmul.f32 %v3028_v31, %v3064_v27 }
 0x19b   :  { %v539_v13 = vadd.f32 %v531_v9, %v517_v38  ;;  %v597_v4 = vrot.slane %v589_v21, 4  ;;  %v569_v3 = vmul.f32 %v3031_v32, %v3064_v27  ;;  %v619_v1 = vrot.slane %v611_v8, 5 }
 0x19c   :  { %v519_v37 = vadd.f32 %v515_v6, %v3008_v48  ;;  %v533_v0 = vrot.slane %v525_v14, 1  ;;  %v591_v40 = vmul.f32 %v3035_v16, %v3064_v27  ;;  %v613_v9 = vmul.f32 %v3038_v51, %v3064_v27 }
 0x19d   :  { %v561_v2 = vadd.f32 %v553_v5, %v539_v13  ;;  %v555_v39 = vrot.slane %v547_v33, 2  ;;  %v514_v28 = vmul.f32 %v3018_v19, %v3073_v7  ;;  %v524_v6 = vmul.f32 %v3020_v20, %v3073_v7 }
 0x19e   :  { %v541_v38 = vadd.f32 %v533_v0, %v519_v37  ;;  %v3096_v5 = vmul.f32 %v504_v15, %v2976_v17  ;;  %v546_v8 = vmul.f32 %v3028_v31, %v3073_v7  ;;  %v568_v13 = vmul.f32 %v3031_v32, %v3073_v7 }
 0x19f   :  { %v583_v30 = vadd.f32 %v575_v10, %v561_v2  ;;  %v577_v14 = vrot.slane %v569_v3, 3  ;;  %v518_v33 = vadd.f32 %v514_v28, %v3008_v48  ;;  %v532_v37 = vrot.slane %v524_v6, 1 }
 0x1a0   :  { %v563_v21 = vadd.f32 %v555_v39, %v541_v38  ;;  %v599_v34 = vrot.slane %v591_v40, 4  ;;  %v621_v63 = vrot.slane %v613_v9, 5  ;;  %v590_v2 = vmul.f32 %v3035_v16, %v3073_v7 }
 0x1a1   :  { %v605_v0 = vadd.f32 %v597_v4, %v583_v30  ;;  %v540_v17 = vadd.f32 %v532_v37, %v518_v33  ;;  %v554_v15 = vrot.slane %v546_v8, 2  ;;  %v612_v62 = vmul.f32 %v3038_v51, %v3073_v7 }
 0x1a2   :  { %v585_v10 = vadd.f32 %v577_v14, %v563_v21  ;;  %v576_v60 = vrot.slane %v568_v13, 3  ;;  %v516_v3 = vmul.f32 %v3018_v19, %v3096_v5  ;;  %v526_v38 = vmul.f32 %v3020_v20, %v3096_v5 }
 0x1a3   :  { %v627_v61 = vadd.f32 %v619_v1, %v605_v0  ;;  %v562_v40 = vadd.f32 %v554_v15, %v540_v17  ;;  %v548_v9 = vmul.f32 %v3028_v31, %v3096_v5  ;;  %v570_v39 = vmul.f32 %v3031_v32, %v3096_v5 }
 0x1a4   :  { %v607_v4 = vadd.f32 %v599_v34, %v585_v10  ;;  %v3521_v28 = vrot.slane %v3012_v49, 6  ;;  %v520_v1 = vadd.f32 %v516_v3, %v3008_v48  ;;  %v534_v30 = vrot.slane %v526_v38, 1 }
 0x1a5   :  { %v2526_v8 = vcvt.f32.s32 %v3066_v24  ;;  %v584_v21 = vadd.f32 %v576_v60, %v562_v40  ;;  %v598_v14 = vrot.slane %v590_v2, 4  ;;  %v620_v33 = vrot.slane %v612_v62, 5 }
 0x1a6   :  { %v649_v6 = vadd.f32 %v3521_v28, %v627_v61  ;;  %v629_v13 = vadd.f32 %v621_v63, %v607_v4  ;;  %v542_v37 = vadd.f32 %v534_v30, %v520_v1  ;;  %v556_v0 = vrot.slane %v548_v9, 2 }
 0x1a7   :  { %v592_v10 = vmul.f32 %v3035_v16, %v3096_v5  ;;  %v3522_v17 = vrot.slane %v3024_v23, 6  ;;  %v606_v49 = vadd.f32 %v598_v14, %v584_v21  ;;  %v666_v61 = vsel %vm665_vm6, %v3043_v18, %v2993_v25 }
 0x1a8   :  { %v657_v34 = vrot.slane %v649_v6, 1  ;;  %v578_v3 = vrot.slane %v570_v39, 3  ;;  %v564_v60 = vadd.f32 %v556_v0, %v542_v37  ;;  %v614_v62 = vmul.f32 %v3038_v51, %v3096_v5 }
 0x1a9   :  { %v651_v15 = vadd.f32 %v3522_v17, %v629_v13  ;;  %v1021_v24 = vmul.u32 8, %v2526_v8  ;;  %v636_v2 = vmul.f32 %v3051_v11, %v2996_v26  ;;  %v628_v38 = vadd.f32 %v620_v33, %v606_v49  ;;  %v3528_v49 = vld [vmem:[#allocation6_spill] sm:$0xff] }
 0x1aa   :  { %v671_v63 = vsel %vm670_vm7, %v666_v61, %v657_v34  ;;  %v3523_v4 = vmin.f32 %v3040_v22, 7.0  ;;  %v586_v25 = vadd.f32 %v578_v3, %v564_v60  ;;  %v600_v40 = vrot.slane %v592_v10, 4  ;;  %v3529_v61 = vld [vmem:[#allocation7_spill] sm:$0xff]  ;;  %v3530_v3 = vld [vmem:[#allocation8_spill] sm:$0xff]  ;;  %v3532_v60 = vld [vmem:[#allocation10_spill] sm:$0xff] }
 0x1ab   :  { %675 = vst [vmem:[%s3446_s4] sm:$0xff] %v671_v63  ;;  %v659_v23 = vrot.slane %v651_v15, 1  ;;  %v668_v9 = vsel %vm665_vm6, %v3064_v27, %v3005_v35  ;;  %v1022_v39 = vrot.slane %v1021_v24, 1  ;;  %v3524_v28 = vrot.slane %v3016_v50, 6  ;;  %v3527_v15 = vld [vmem:[#allocation5_spill] sm:$0xff]  ;;  %v3534_v24 = vld [vmem:[#allocation12_spill] sm:$0xff] }
 0x1ac   :  { %v2529_v18 = vtrunc.f32 %v3523_v4  ;;  %v608_v8 = vadd.f32 %v600_v40, %v586_v25  ;;  %v622_v13 = vrot.slane %v614_v62, 5  ;;  %v644_v33 = vrot.slane %v636_v2, 6  ;;  %v3533_v62 = vld [vmem:[#allocation11_spill] sm:$0xff]  ;;  %v3535_v2 = vld [vmem:[#allocation13_spill] sm:$0xff]  ;;  %v3538_v4 = vld [vmem:[#allocation16_spill] sm:$0xff] }
 0x1ad   :  { %v650_v6 = vadd.f32 %v3524_v28, %v628_v38  ;;  %v673_v1 = vsel %vm670_vm7, %v668_v9, %v659_v23  ;;  %v1023_v22 = vadd.s32 %v1022_v39, %v3080_v42  ;;  %v667_v27 = vsel %vm665_vm6, %v3073_v7, %v2999_v29  ;;  %v3536_v38 = vld [vmem:[#allocation14_spill] sm:$0xff]  ;;  %v3537_v23 = vld [vmem:[#allocation15_spill] sm:$0xff]  ;;  %v3542_v39 = vld [vmem:[#allocation20_spill] sm:$0xff] }
 0x1ae   :  { %v2530_v30 = vcvt.f32.s32 %v2529_v18  ;;  %677 = vst [vmem:[%s3446_s4 + $0x10] sm:$0xff] %v673_v1  ;;  %v630_v35 = vadd.f32 %v622_v13, %v608_v8  ;;  %v669_v10 = vsel %vm665_vm6, %v3096_v5, %v3051_v11  ;;  %v3525_v17 = vmov 1.0   ;;  %v3191_v5 = vld [vmem:[%s3445_s3] sm:$0xff]  ;;  %v3540_v25 = vld [vmem:[#allocation18_spill] sm:$0xff]  ;;  %v3541_v9 = vld [vmem:[#allocation19_spill] sm:$0xff] }
 0x1af   :  { %v658_v21 = vrot.slane %v650_v6, 1  ;;  %v3526_v11 = vmov 1.0|1.0   ;;  %v3539_v18 = vld [vmem:[#allocation17_spill] sm:$0xff]  ;;  %v3544_v6 = vld [vmem:[#allocation22_spill] sm:$0xff] }
 0x1b0   :  { %v1024_v14 = vrot.slane %v2530_v30, 2  ;;  %v652_v37 = vadd.f32 %v644_v33, %v630_v35  ;;  %v3543_v28 = vld [vmem:[#allocation21_spill] sm:$0xff]  ;;  %v3275_v30 = vpop.f32.mrb[2].mxu1 }
 0x1b1   :  { %v672_v50 = vsel %vm670_vm7, %v667_v27, %v658_v21  ;;  %v2338_v8 = vpop.f32.mrb[3].mxu1 }
 0x1b2   :  { %v3150_v34 = vadd.s32 %v1024_v14, %v1023_v22  ;;  %676 = vst [vmem:[%s3446_s4 + $0x8] sm:$0xff] %v672_v50  ;;  %679 = vmatprep.subr.mxu0 %v672_v50  ;;  %v660_v0 = vrot.slane %v652_v37, 1 }
 0x1b3   :  { %680 = vmatpush1.xpose.msra.mxu0 %v671_v63  ;;  %v3531_v63 = vld [vmem:[#allocation9_spill] sm:$0xff] }
 0x1b4   :  { %v2095_v42 = vadd.s32 4294967040, %v3150_v34  ;;  %v674_v29 = vsel %vm670_vm7, %v669_v10, %v660_v0  ;;  %v3250_v40 = vrot.slane %v3150_v34, %v2648_v41 }
 0x1b5   :  { %678 = vst [vmem:[%s3446_s4 + $0x18] sm:$0xff] %v674_v29  ;;  %749 = vmatprep.subr.mxu0 %v674_v29 }
 0x1b6   :  { %v3160_v7 = vrot.slane %v2095_v42, %v2648_v41  ;;  %744 = vmatmul.mubr.f32.vlgmr.msra.gmra.mrb[2].mxu0 %v3525_v17  ;;  %v3545_v41 = vmov 0.0|0.0  }
 0x1b7   :  { %813 = vmatprep.mubr.f32.mxu0 %v3525_v17  ;;  %750 = vmatpush1.xpose.msra.mxu0 %v673_v1  ;;  %v3548_v1 = vld [vmem:[#allocation24_spill] sm:$0xff] }
 0x1b8   :  { %vm1218_vm8 = vcmp.eq.s32.totalorder %v2651_v43, %v3160_v7  ;;  %vm1219_vm9 = vcmp.eq.s32.totalorder %v2654_v44, %v3160_v7  ;;  %vm1202_vm10 = vcmp.eq.s32.totalorder %v2645_v36, %v3160_v7  ;;  %vm1203_vm12 = vcmp.eq.s32.totalorder %v2657_v45, %v3160_v7  ;;  %2339 = vmatprep.subr.mxu0 %v3520_v12 }
 0x1b9   :  { %vm2462_vm11 = vmpackc.low %vm1219_vm9, %vm1218_vm8  ;;  %vm1220_vm13 = vcmp.eq.s32.totalorder %v2660_v46, %v3160_v7  ;;  %vm1221_vm14 = vcmp.eq.s32.totalorder %v2663_v47, %v3160_v7  ;;  %vm1204_vm3 = vcmp.eq.s32.totalorder %v2698_v52, %v3160_v7  ;;  %vm1205_vm4 = vcmp.eq.s32.totalorder %v2701_v53, %v3160_v7 }
 0x1ba   :  { %2463 = vmatprep.subr.msk.bf16.mxu1 %vm2462_vm11, %v3526_v11  ;;  %vm2464_vm15 = vmpackc.low %vm1203_vm12, %vm1202_vm10  ;;  %vm1222_vm5 = vcmp.eq.s32.totalorder %v2705_v54, %v3160_v7  ;;  %vm1223_vm8 = vcmp.eq.s32.totalorder %v2708_v55, %v3160_v7  ;;  %vm1206_vm11 = vcmp.eq.s32.totalorder %v2731_v56, %v3160_v7  ;;  %vm1207_vm12 = vcmp.eq.s32.totalorder %v2734_v57, %v3160_v7 }
 0x1bb   :  { %2465 = vmatpush3.bf16.xpose.msk.msra.mxu1 %vm2464_vm15, %v3526_v11  ;;  %vm2466_vm2 = vmpackc.low %vm1221_vm14, %vm1220_vm13  ;;  %vm1224_vm13 = vcmp.eq.s32.totalorder %v2738_v58, %v3160_v7  ;;  %vm1225_vm14 = vcmp.eq.s32.totalorder %v2741_v59, %v3160_v7 }
 0x1bc   :  { %2467 = vmatprep.subr.msk.bf16.mxu1 %vm2466_vm2, %v3526_v11  ;;  %vm2468_vm9 = vmpackc.low %vm1205_vm4, %vm1204_vm3  ;;  %vm1208_vm3 = vcmp.eq.s32.totalorder %v3527_v15, %v3160_v7  ;;  %vm1209_vm4 = vcmp.eq.s32.totalorder %v3528_v49, %v3160_v7 }
 0x1bd   :  { %vm2470_vm10 = vmpackc.low %vm1223_vm8, %vm1222_vm5  ;;  %vm1226_vm5 = vcmp.eq.s32.totalorder %v3529_v61, %v3160_v7  ;;  %vm1227_vm8 = vcmp.eq.s32.totalorder %v3530_v3, %v3160_v7 }
 0x1be   :  { %814 = vmatmul.mubr.f32.vlgmr.msra.gmra.mrb[2].mxu0 %v3525_v17  ;;  %vm2472_vm15 = vmpackc.low %vm1207_vm12, %vm1206_vm11  ;;  %vm1210_vm11 = vcmp.eq.s32.totalorder %v3531_v63, %v3160_v7  ;;  %vm1211_vm12 = vcmp.eq.s32.totalorder %v3532_v60, %v3160_v7 }
 0x1bf   :  { %2340 = vmatpush3.msra.mxu0 %v3191_v5  ;;  %2341 = vmatprep.mubr.msk.f32.mxu0 %vm2585_vm0, %v3520_v12  ;;  %vm2474_vm2 = vmpackc.low %vm1225_vm14, %vm1224_vm13  ;;  %vm1228_vm13 = vcmp.eq.s32.totalorder %v3533_v62, %v3160_v7  ;;  %vm1229_vm14 = vcmp.eq.s32.totalorder %v3534_v24, %v3160_v7 }
 0x1c3   :  { %2469 = vmatpush3.bf16.xpose.msk.msra.mxu1 %vm2468_vm9, %v3526_v11  ;;  %vm2476_vm9 = vmpackc.low %vm1209_vm4, %vm1208_vm3  ;;  %vm1212_vm3 = vcmp.eq.s32.totalorder %v3535_v2, %v3160_v7  ;;  %vm1213_vm4 = vcmp.eq.s32.totalorder %v3536_v38, %v3160_v7 }
 0x1c4   :  { %2471 = vmatprep.subr.msk.bf16.mxu1 %vm2470_vm10, %v3526_v11  ;;  %vm2478_vm10 = vmpackc.low %vm1227_vm8, %vm1226_vm5  ;;  %vm1230_vm5 = vcmp.eq.s32.totalorder %v3537_v23, %v3160_v7  ;;  %vm1231_vm8 = vcmp.eq.s32.totalorder %v3538_v4, %v3160_v7 }
 0x1cb   :  { %2473 = vmatpush3.bf16.xpose.msk.msra.mxu1 %vm2472_vm15, %v3526_v11  ;;  %vm2480_vm15 = vmpackc.low %vm1211_vm12, %vm1210_vm11  ;;  %vm1214_vm11 = vcmp.eq.s32.totalorder %v3539_v18, %v3160_v7  ;;  %vm1215_vm12 = vcmp.eq.s32.totalorder %v3540_v25, %v3160_v7 }
 0x1cc   :  { %2475 = vmatprep.subr.msk.bf16.mxu1 %vm2474_vm2, %v3526_v11  ;;  %vm2482_vm2 = vmpackc.low %vm1229_vm14, %vm1228_vm13  ;;  %vm1046_vm14 = vcmp.eq.s32.totalorder %v2651_v43, %v3250_v40  ;;  %v3546_v43 = vld [vmem:[#allocation25_spill] sm:$0xff] }
 0x1cd   :  { %vm2488_vm13 = vmpackc.low %vm1215_vm12, %vm1214_vm11  ;;  %vm895_vm11 = vcmask 64512   ;;  %vm1030_vm12 = vcmp.eq.s32.totalorder %v2645_v36, %v3250_v40 }
 0x1d3   :  { %2477 = vmatpush3.bf16.xpose.msk.msra.mxu1 %vm2476_vm9, %v3526_v11  ;;  %vm2484_vm9 = vmpackc.low %vm1213_vm4, %vm1212_vm3  ;;  %vm1233_vm3 = vcmp.eq.s32.totalorder %v3542_v39, %v3160_v7 }
 0x1d4   :  { %2479 = vmatprep.subr.msk.bf16.mxu1 %vm2478_vm10, %v3526_v11  ;;  %vm2486_vm10 = vmpackc.low %vm1231_vm8, %vm1230_vm5  ;;  %vm1216_vm5 = vcmp.eq.s32.totalorder %v3543_v28, %v3160_v7  ;;  %vm1217_vm8 = vcmp.eq.s32.totalorder %v3544_v6, %v3160_v7 }
 0x1db   :  { %2481 = vmatpush3.bf16.xpose.msk.msra.mxu1 %vm2480_vm15, %v3526_v11  ;;  %vm1047_vm15 = vcmp.eq.s32.totalorder %v2654_v44, %v3250_v40  ;;  %v3547_v44 = vld [vmem:[#allocation23_spill] sm:$0xff] }
 0x1dc   :  { %2483 = vmatprep.subr.msk.bf16.mxu1 %vm2482_vm2, %v3526_v11  ;;  %vm1232_vm2 = vcmp.eq.s32.totalorder %v3541_v9, %v3160_v7  ;;  %vm2430_vm4 = vmpackc.low %vm1047_vm15, %vm1046_vm14  ;;  %vm1048_vm14 = vcmp.eq.s32.totalorder %v2660_v46, %v3250_v40  ;;  %vm1049_vm15 = vcmp.eq.s32.totalorder %v2663_v47, %v3250_v40 }
 0x1dd   :  { %2431 = vmatprep.subr.msk.bf16.mxu0 %vm2430_vm4, %v3526_v11  ;;  %vm1032_vm4 = vcmp.eq.s32.totalorder %v2698_v52, %v3250_v40 }
 0x1e3   :  { %2485 = vmatpush3.bf16.xpose.msk.msra.mxu1 %vm2484_vm9, %v3526_v11  ;;  %vm2490_vm9 = vmpackc.low %vm1233_vm3, %vm1232_vm2 }
 0x1e4   :  { %2487 = vmatprep.subr.msk.bf16.mxu1 %vm2486_vm10, %v3526_v11  ;;  %vm2492_vm10 = vmpackc.low %vm1217_vm8, %vm1216_vm5  ;;  %vm1033_vm5 = vcmp.eq.s32.totalorder %v2701_v53, %v3250_v40  ;;  %vm1050_vm8 = vcmp.eq.s32.totalorder %v2705_v54, %v3250_v40  ;;  %v3549_v53 = vld [vmem:[#allocation26_spill] sm:$0xff] }
 0x1e5   :  { %vm2434_vm3 = vmpackc.low %vm1049_vm15, %vm1048_vm14  ;;  %vm1035_vm14 = vcmp.eq.s32.totalorder %v2734_v57, %v3250_v40  ;;  %vm1052_vm15 = vcmp.eq.s32.totalorder %v2738_v58, %v3250_v40 }
 0x1eb   :  { %2489 = vmatpush3.bf16.xpose.msk.msra.mxu1 %vm2488_vm13, %v3526_v11  ;;  %vm1031_vm13 = vcmp.eq.s32.totalorder %v2657_v45, %v3250_v40 }
 0x1ec   :  { %2491 = vmatprep.subr.msk.bf16.mxu1 %vm2490_vm9, %v3526_v11  ;;  %vm2432_vm2 = vmpackc.low %vm1031_vm13, %vm1030_vm12  ;;  %vm1051_vm9 = vcmp.eq.s32.totalorder %v2708_v55, %v3250_v40  ;;  %vm1034_vm13 = vcmp.eq.s32.totalorder %v2731_v56, %v3250_v40 }
 0x1ed   :  { %vm2438_vm12 = vmpackc.low %vm1051_vm9, %vm1050_vm8  ;;  %vm1037_vm8 = vcmp.eq.s32.totalorder %v3528_v49, %v3250_v40  ;;  %vm1054_vm9 = vcmp.eq.s32.totalorder %v3529_v61, %v3250_v40 }
 0x1f3   :  { %2493 = vmatpush3.bf16.xpose.msk.msra.mxu1 %vm2492_vm10, %v3526_v11  ;;  %vm2436_vm10 = vmpackc.low %vm1033_vm5, %vm1032_vm4  ;;  %vm1036_vm5 = vcmp.eq.s32.totalorder %v3527_v15, %v3250_v40 }
 0x1f4   :  { %2494 = vmatprep.subr.bf16.mxu1 %v3545_v41 }
 0x1fa   :  { %2320 = vmatmul.mubr.f32.vlgmr.msra.gmra.mrb[4].mxu1 %v3546_v43 }
 0x1fb   :  { %2496 = vmatpush3.bf16.msra.mxu1 %v3547_v44  ;;  %2352 = vmatprep.mubr.msk.f32.mxu1 %vm2585_vm0, %v3520_v12 }
 0x1fc   :  { %2497 = vmatprep.subr.bf16.mxu1 %v3545_v41 }
 0x1ff   :  { %2499 = vmatpush3.bf16.msra.mxu1 %v3548_v1 }
 0x200   :  { %2355 = vmatprep.subr.mxu1 %v3520_v12 }
 0x291   :  { %v815_v13 = vpop.f32.mrb[2].mxu0 }
 0x292   :  { %v819_v22 = vmul.f32 0.001953125, %v815_v13  ;;  %v817_v21 = vpop.f32.mrb[3].mxu0 }
 0x294   :  { %2342 = vmatmul.mubr.msk.f32.vlgmr.msra.gmra.mrb[4].mxu0 %vm895_vm11, %v819_v22 }
 0x295   :  { %2433 = vmatpush3.bf16.xpose.msk.msra.mxu0 %vm2432_vm2, %v3526_v11  ;;  %2285 = vmatprep.mubr.f32.mxu0 %v3546_v43  ;;  %vm1053_vm2 = vcmp.eq.s32.totalorder %v2741_v59, %v3250_v40 }
 0x296   :  { %2435 = vmatprep.subr.msk.bf16.mxu0 %vm2434_vm3, %v3526_v11  ;;  %vm2440_vm3 = vmpackc.low %vm1035_vm14, %vm1034_vm13  ;;  %vm1038_vm14 = vcmp.eq.s32.totalorder %v3531_v63, %v3250_v40 }
 0x297   :  { %vm2442_vm4 = vmpackc.low %vm1053_vm2, %vm1052_vm15  ;;  %vm1039_vm15 = vcmp.eq.s32.totalorder %v3532_v60, %v3250_v40  ;;  %vm1056_vm2 = vcmp.eq.s32.totalorder %v3533_v62, %v3250_v40 }
 0x29d   :  { %2437 = vmatpush3.bf16.xpose.msk.msra.mxu0 %vm2436_vm10, %v3526_v11  ;;  %vm1055_vm10 = vcmp.eq.s32.totalorder %v3530_v3, %v3250_v40 }
 0x29e   :  { %2439 = vmatprep.subr.msk.bf16.mxu0 %vm2438_vm12, %v3526_v11  ;;  %vm2444_vm12 = vmpackc.low %vm1037_vm8, %vm1036_vm5  ;;  %vm1040_vm8 = vcmp.eq.s32.totalorder %v3535_v2, %v3250_v40 }
 0x29f   :  { %vm2446_vm13 = vmpackc.low %vm1055_vm10, %vm1054_vm9  ;;  %vm1041_vm9 = vcmp.eq.s32.totalorder %v3536_v38, %v3250_v40  ;;  %vm1058_vm10 = vcmp.eq.s32.totalorder %v3537_v23, %v3250_v40 }
 0x2a5   :  { %2441 = vmatpush3.bf16.xpose.msk.msra.mxu0 %vm2440_vm3, %v3526_v11  ;;  %vm1057_vm3 = vcmp.eq.s32.totalorder %v3534_v24, %v3250_v40 }
 0x2a6   :  { %2443 = vmatprep.subr.msk.bf16.mxu0 %vm2442_vm4, %v3526_v11  ;;  %vm2448_vm4 = vmpackc.low %vm1039_vm15, %vm1038_vm14  ;;  %vm1042_vm15 = vcmp.eq.s32.totalorder %v3539_v18, %v3250_v40 }
 0x2a7   :  { %vm2450_vm5 = vmpackc.low %vm1057_vm3, %vm1056_vm2  ;;  %vm1043_vm2 = vcmp.eq.s32.totalorder %v3540_v25, %v3250_v40  ;;  %vm1060_vm3 = vcmp.eq.s32.totalorder %v3541_v9, %v3250_v40 }
 0x2ad   :  { %2445 = vmatpush3.bf16.xpose.msk.msra.mxu0 %vm2444_vm12, %v3526_v11  ;;  %vm1059_vm12 = vcmp.eq.s32.totalorder %v3538_v4, %v3250_v40 }
 0x2ae   :  { %2447 = vmatprep.subr.msk.bf16.mxu0 %vm2446_vm13, %v3526_v11  ;;  %vm2452_vm13 = vmpackc.low %vm1041_vm9, %vm1040_vm8  ;;  %vm1044_vm9 = vcmp.eq.s32.totalorder %v3543_v28, %v3250_v40 }
 0x2af   :  { %vm2454_vm14 = vmpackc.low %vm1059_vm12, %vm1058_vm10  ;;  %vm1045_vm10 = vcmp.eq.s32.totalorder %v3544_v6, %v3250_v40 }
 0x2b0   :  { %vm2460_vm12 = vmpackc.low %vm1045_vm10, %vm1044_vm9 }
 0x2b5   :  { %2449 = vmatpush3.bf16.xpose.msk.msra.mxu0 %vm2448_vm4, %v3526_v11  ;;  %vm1061_vm4 = vcmp.eq.s32.totalorder %v3542_v39, %v3250_v40 }
 0x2b6   :  { %2451 = vmatprep.subr.msk.bf16.mxu0 %vm2450_vm5, %v3526_v11  ;;  %vm2456_vm5 = vmpackc.low %vm1043_vm2, %vm1042_vm15 }
 0x2b7   :  { %vm2458_vm8 = vmpackc.low %vm1061_vm4, %vm1060_vm3 }
 0x2bd   :  { %2453 = vmatpush3.bf16.xpose.msk.msra.mxu0 %vm2452_vm13, %v3526_v11 }
 0x2be   :  { %2455 = vmatprep.subr.msk.bf16.mxu0 %vm2454_vm14, %v3526_v11 }
 0x2c5   :  { %2457 = vmatpush3.bf16.xpose.msk.msra.mxu0 %vm2456_vm5, %v3526_v11 }
 0x2c6   :  { %2459 = vmatprep.subr.msk.bf16.mxu0 %vm2458_vm8, %v3526_v11 }
 0x2cd   :  { %2461 = vmatpush3.bf16.xpose.msk.msra.mxu0 %vm2460_vm12, %v3526_v11  ;;  %v1364_v36 = vpop.f32.mrb[4].mxu1 }
 0x2ce   :  { %v1366_v45 = vpop.f32.mrb[5].mxu1  ;;  %v1383_v46 = vmax.f32 %v1364_v36, 1.0  ;;  %vm1371_vm13 = vcmp.gt.f32.partialorder %v1364_v36, 0.0 }
 0x2cf   :  { %v1384_v52 = vmax.f32 %v1366_v45, 1.0  ;;  %v2162_v7 = vsel %vm1371_vm13, 1.0, %v3520_v12  ;;  %vm1372_vm14 = vcmp.gt.f32.partialorder %v1366_v45, 0.0 }
 0x2d0   :  { %2558 = vrcp.f32 %v1383_v46  ;;  %v1533_v24 = vmul.f32 %v2162_v7, %v2996_v26  ;;  %v2163_v2 = vsel %vm1372_vm14, 1.0, %v3520_v12 }
 0x2d1   :  { %2560 = vrcp.f32 %v1384_v52  ;;  %v1534_v25 = vmul.f32 %v2163_v2, %v2996_v26 }
 0x2d2   :  { %v1541_v28 = vrot.slane %v1533_v24, 6 }
 0x2d3   :  { %v1542_v1 = vrot.slane %v1534_v25, 6 }
 0x2d4   :  { %2286 = vmatmul.mubr.f32.vlgmr.msra.gmra.mrb[6].mxu0 %v3546_v43 }
 0x2d5   :  { %1640 = vmatprep.mubr.f32.mxu0 %v3525_v17 }
 0x2da   :  { %v2559_v47 = vpop.eup %2558 }
 0x2db   :  { %v1400_v54 = vrot.slane %v2559_v47, %v3549_v53  ;;  %v2561_v33 = vpop.eup %2560 }
 0x2dc   :  { %v1404_v34 = vrot.slane %v2561_v33, %v3549_v53 }
 0x2dd   :  { %v1407_v55 = vmul.f32 %v1400_v54, %v1364_v36 }
 0x2de   :  { %v1408_v10 = vmul.f32 %v1404_v34, %v1366_v45 }
 0x2df   :  { %v1413_v56 = vmul.f32 %v1407_v55, %v3018_v19  ;;  %v1423_v57 = vmul.f32 %v1407_v55, %v3020_v20  ;;  %v1445_v14 = vmul.f32 %v1407_v55, %v3028_v31  ;;  %v1467_v50 = vmul.f32 %v1407_v55, %v3031_v32 }
 0x2e0   :  { %v1489_v0 = vmul.f32 %v1407_v55, %v3035_v16  ;;  %v1511_v29 = vmul.f32 %v1407_v55, %v3038_v51  ;;  %v1414_v49 = vmul.f32 %v1408_v10, %v3018_v19  ;;  %v1424_v61 = vmul.f32 %v1408_v10, %v3020_v20 }
 0x2e1   :  { %v1417_v58 = vadd.f32 %v1413_v56, %v3008_v48  ;;  %v1431_v59 = vrot.slane %v1423_v57, 1  ;;  %v1453_v35 = vrot.slane %v1445_v14, 2  ;;  %v1475_v42 = vrot.slane %v1467_v50, 3 }
 0x2e2   :  { %v1497_v15 = vrot.slane %v1489_v0, 4  ;;  %v1418_v3 = vadd.f32 %v1414_v49, %v3008_v48  ;;  %v1432_v63 = vrot.slane %v1424_v61, 1  ;;  %v1446_v60 = vmul.f32 %v1408_v10, %v3028_v31 }
 0x2e3   :  { %v1439_v27 = vadd.f32 %v1431_v59, %v1417_v58  ;;  %v1519_v62 = vrot.slane %v1511_v29, 5  ;;  %v1468_v18 = vmul.f32 %v1408_v10, %v3031_v32  ;;  %v1490_v39 = vmul.f32 %v1408_v10, %v3035_v16 }
 0x2e4   :  { %v1440_v23 = vadd.f32 %v1432_v63, %v1418_v3  ;;  %v1454_v4 = vrot.slane %v1446_v60, 2  ;;  %v1512_v44 = vmul.f32 %v1408_v10, %v3038_v51  ;;  %v1566_v47 = vsel %vm665_vm6, %v1408_v10, %v2163_v2 }
 0x2e5   :  { %v1461_v37 = vadd.f32 %v1453_v35, %v1439_v27  ;;  %v1476_v9 = vrot.slane %v1468_v18, 3  ;;  %v1498_v43 = vrot.slane %v1490_v39, 4  ;;  %v1565_v52 = vsel %vm665_vm6, %v1407_v55, %v2162_v7  ;;  %v2174_v55 = vld [vmem:[%s3444_s2 + $0x1] sm:$0x1] }
 0x2e6   :  { %v1462_v40 = vadd.f32 %v1454_v4, %v1440_v23  ;;  %v1520_v13 = vrot.slane %v1512_v44, 5  ;;  %2353 = vmatmul.mubr.msk.f32.vlgmr.msra.gmra.mrb[6].mxu1 %vm821_vm1, %v2174_v55 }
 0x2e7   :  { %v1483_v11 = vadd.f32 %v1475_v42, %v1461_v37  ;;  %2356 = vmatpush3.msra.mxu1 %v3191_v5  ;;  %2357 = vmatprep.mubr.msk.f32.mxu1 %vm2585_vm0, %v3520_v12 }
 0x2e8   :  { %v1484_v41 = vadd.f32 %v1476_v9, %v1462_v40 }
 0x2e9   :  { %v1505_v38 = vadd.f32 %v1497_v15, %v1483_v11 }
 0x2ea   :  { %v1506_v8 = vadd.f32 %v1498_v43, %v1484_v41 }
 0x2eb   :  { %v1527_v6 = vadd.f32 %v1519_v62, %v1505_v38 }
 0x2ec   :  { %v1528_v21 = vadd.f32 %v1520_v13, %v1506_v8 }
 0x2ed   :  { %v1549_v22 = vadd.f32 %v1541_v28, %v1527_v6 }
 0x2ee   :  { %v1550_v36 = vadd.f32 %v1542_v1, %v1528_v21 }
 0x2ef   :  { %v1557_v46 = vrot.slane %v1549_v22, 1 }
 0x2f0   :  { %v1558_v45 = vrot.slane %v1550_v36, 1 }
 0x2f1   :  { %v3382_v56 = vsel %vm670_vm7, %v1565_v52, %v1557_v46 }
 0x2f2   :  { %v3379_v54 = vsel %vm670_vm7, %v1566_v47, %v1558_v45  ;;  %2172 = vst [vmem:[%s3446_s4 + $0x30] sm:$0xff] %v3382_v56 }
 0x2f3   :  { %2173 = vst [vmem:[%s3446_s4 + $0x38] sm:$0xff] %v3379_v54 }
 0x367   :  { %v965_v57 = vpop.f32.mrb[4].mxu0 }
 0x368   :  { %v966_v58 = vadd.f32 %v965_v57, %v3275_v30  ;;  %v2343_v59 = vpop.f32.mrb[5].mxu0 }
 0x36a   :  { %969 = vst [vmem:[%s3447_s5] sm:$0x1] %v966_v58 }
 0x3a7   :  { %v1192_v14 = vpop.f32.mrb[6].mxu0 }
 0x3a8   :  { %v1381_v33 = vmax.f32 %v1192_v14, 1.0  ;;  %v1194_v27 = vpop.f32.mrb[7].mxu0  ;;  %vm1369_vm0 = vcmp.gt.f32.partialorder %v1192_v14, 0.0 }
 0x3a9   :  { %v1382_v35 = vmax.f32 %v1194_v27, 1.0  ;;  %vm1370_vm1 = vcmp.gt.f32.partialorder %v1194_v27, 0.0 }
 0x3aa   :  { %2562 = vrcp.f32 %v1381_v33  ;;  %v2161_v38 = vsel %vm1370_vm1, 1.0, %v3520_v12 }
 0x3ab   :  { %2564 = vrcp.f32 %v1382_v35 }
 0x3b4   :  { %v2563_v50 = vpop.eup %2562 }
 0x3b5   :  { %v2565_v34 = vpop.eup %2564  ;;  %v1392_v5 = vrot.slane %v2563_v50, %v3549_v53 }
 0x3b6   :  { %v1396_v37 = vrot.slane %v2565_v34, %v3549_v53  ;;  %v2160_v53 = vsel %vm1369_vm0, 1.0, %v3520_v12 }
 0x3b7   :  { %v1405_v42 = vmul.f32 %v1392_v5, %v1192_v14 }
 0x3b8   :  { %v1406_v0 = vmul.f32 %v1396_v37, %v1194_v27 }
 0x3b9   :  { %v1411_v30 = vmul.f32 %v1405_v42, %v3018_v19  ;;  %v1421_v10 = vmul.f32 %v1405_v42, %v3020_v20  ;;  %v1443_v7 = vmul.f32 %v1405_v42, %v3028_v31  ;;  %v1465_v61 = vmul.f32 %v1405_v42, %v3031_v32 }
 0x3ba   :  { %v1412_v29 = vmul.f32 %v1406_v0, %v3018_v19  ;;  %v1422_v11 = vmul.f32 %v1406_v0, %v3020_v20  ;;  %v1487_v3 = vmul.f32 %v1405_v42, %v3035_v16  ;;  %v1444_v2 = vmul.f32 %v1406_v0, %v3028_v31 }
 0x3bb   :  { %v1415_v15 = vadd.f32 %v1411_v30, %v3008_v48  ;;  %v1429_v49 = vrot.slane %v1421_v10, 1  ;;  %v1451_v24 = vrot.slane %v1443_v7, 2  ;;  %v1466_v19 = vmul.f32 %v1406_v0, %v3031_v32 }
 0x3bc   :  { %v1416_v63 = vadd.f32 %v1412_v29, %v3008_v48  ;;  %v1430_v60 = vrot.slane %v1422_v11, 1  ;;  %v1509_v20 = vmul.f32 %v1405_v42, %v3038_v51  ;;  %v1473_v18 = vrot.slane %v1465_v61, 3 }
 0x3bd   :  { %v1437_v62 = vadd.f32 %v1429_v49, %v1415_v15  ;;  %v1452_v25 = vrot.slane %v1444_v2, 2  ;;  %v1488_v40 = vmul.f32 %v1406_v0, %v3035_v16  ;;  %v1495_v9 = vrot.slane %v1487_v3, 4 }
 0x3be   :  { %v1438_v23 = vadd.f32 %v1430_v60, %v1416_v63  ;;  %v1531_v48 = vmul.f32 %v2160_v53, %v2996_v26  ;;  %v1474_v6 = vrot.slane %v1466_v19, 3  ;;  %v1510_v31 = vmul.f32 %v1406_v0, %v3038_v51 }
 0x3bf   :  { %v1459_v4 = vadd.f32 %v1451_v24, %v1437_v62  ;;  %v1532_v32 = vmul.f32 %v2161_v38, %v2996_v26  ;;  %v1517_v43 = vrot.slane %v1509_v20, 5  ;;  %v1496_v12 = vrot.slane %v1488_v40, 4 }
 0x3c0   :  { %v1460_v28 = vadd.f32 %v1452_v25, %v1438_v23  ;;  %v1539_v8 = vrot.slane %v1531_v48, 6  ;;  %v1518_v22 = vrot.slane %v1510_v31, 5  ;;  %v1563_v47 = vsel %vm665_vm6, %v1405_v42, %v2160_v53 }
 0x3c1   :  { %v1481_v39 = vadd.f32 %v1473_v18, %v1459_v4  ;;  %v1540_v16 = vrot.slane %v1532_v32, 6  ;;  %v1564_v26 = vsel %vm665_vm6, %v1406_v0, %v2161_v38 }
 0x3c2   :  { %v1482_v44 = vadd.f32 %v1474_v6, %v1460_v28 }
 0x3c3   :  { %v1503_v41 = vadd.f32 %v1495_v9, %v1481_v39 }
 0x3c4   :  { %v1504_v13 = vadd.f32 %v1496_v12, %v1482_v44 }
 0x3c5   :  { %v1525_v1 = vadd.f32 %v1517_v43, %v1503_v41 }
 0x3c6   :  { %v1526_v36 = vadd.f32 %v1518_v22, %v1504_v13 }
 0x3c7   :  { %v1547_v21 = vadd.f32 %v1539_v8, %v1525_v1 }
 0x3c8   :  { %v1548_v45 = vadd.f32 %v1540_v16, %v1526_v36 }
 0x3c9   :  { %v1555_v46 = vrot.slane %v1547_v21, 1 }
 0x3ca   :  { %v1556_v52 = vrot.slane %v1548_v45, 1 }
 0x3cb   :  { %v1567_v51 = vsel %vm670_vm7, %v1563_v47, %v1555_v46 }
 0x3cc   :  { %2170 = vst [vmem:[%s3446_s4 + $0x20] sm:$0xff] %v1567_v51  ;;  %v1568_v55 = vsel %vm670_vm7, %v1564_v26, %v1556_v52 }
 0x3cd   :  { %2171 = vst [vmem:[%s3446_s4 + $0x28] sm:$0xff] %v1568_v55  ;;  %1576 = vmatprep.subr.mxu0 %v1568_v55 }
 0x3ce   :  { %1577 = vmatpush1.xpose.msra.mxu0 %v1567_v51 }
 0x3cf   :  { %1646 = vmatprep.subr.mxu0 %v3379_v54 }
 0x3d1   :  { %1641 = vmatmul.mubr.f32.vlgmr.msra.gmra.mrb[8].mxu0 %v3525_v17 }
 0x3d2   :  { %1647 = vmatpush1.xpose.msra.mxu0 %v3382_v56  ;;  %1710 = vmatprep.mubr.f32.mxu0 %v3525_v17 }
 0x3d9   :  { %1711 = vmatmul.mubr.f32.vlgmr.msra.gmra.mrb[8].mxu0 %v3525_v17 }
 0x4ac   :  { %v1712_v57 = vpop.f32.mrb[8].mxu0 }
 0x4ad   :  { %v1716_v58 = vmul.f32 0.001953125, %v1712_v57  ;;  %v1714_v59 = vpop.f32.mrb[9].mxu0 }
 0x4af   :  { %2358 = vmatmul.mubr.msk.f32.vlgmr.msra.gmra.mrb[6].mxu1 %vm895_vm11, %v1716_v58 }
 0x582   :  { %v1861_v14 = vpop.f32.mrb[6].mxu1 }
 0x583   :  { %2177 = vst [vmem:[%s3447_s5 + $0x1] sm:$0x1] %v1861_v14  ;;  %v2359_v33 = vpop.f32.mrb[7].mxu1 }
 0x584   :  { %1875 = vsyncpa [#allocation3], 1 }

</bundles_post_ra>
